<compile_context>
chip_gen: v5e
topology: v5e:2x2
jax: 0.10.0
libtpu: 0.0.40
codegen_flags: <defaults>
</compile_context>

<pallas_src>
import jax
import jax.numpy as jnp
import numpy as np
from jax.experimental import pallas as pl
from jax.experimental.pallas import tpu as pltpu

# ----- module hyper-parameters (consistent with GLCMconv1(inC=4)) -----------
N = 2            # batch
INC = 4          # input channels
OUTC = 3         # output channels (default outC=3)
K = 3            # kernel_size
H = W = 16       # spatial
HO = H - K + 1   # padding = 0 -> VALID conv
WO = W - K + 1
HOWO = HO * WO
FEAT = 6         # Feature_num hard-coded to 6 in GLCMconv1 (Wconv1(6, ...))
HID = 256        # Fea2Weight hidden width
G = INC * K * K  # LayerNorm([inC, k, k]) group size
D = OUTC * G     # total per-sample weight count (k*k*inC*outC)
EPS = 1e-5       # PyTorch LayerNorm default eps


# ---------- fused Pallas kernel: meta MLP + LayerNorm + dynamic conv ---------
def glcm_conv1_fused_kernel(feat_ref, w1_ref, b1_ref, w2r_ref, b2r_ref,
                            g_ref, bb_ref, p_ref, o_ref):
    hp = jax.lax.Precision.HIGHEST
    feat = feat_ref[0]                                                # (1, FEAT)

    # Fea2Weight: Linear(FEAT, HID) -> ReLU -> Linear(HID, D)
    h = jnp.dot(feat, w1_ref[...], precision=hp,
                preferred_element_type=jnp.float32) + b1_ref[...]     # (1, HID)
    h = jnp.maximum(h, 0.0)

    # second linear, pre-split per output channel: each row is (1, G)
    rows = [
        jnp.dot(h, w2r_ref[oc], precision=hp,
                preferred_element_type=jnp.float32)
        for oc in range(OUTC)
    ]
    w5 = jnp.concatenate(rows, axis=0) + b2r_ref[...]                 # (OUTC, G)

    # LayerNorm over the (inC, k, k) group, per output channel, then / inC
    mu = jnp.mean(w5, axis=-1, keepdims=True)
    var = jnp.mean((w5 - mu) ** 2, axis=-1, keepdims=True)
    wn = (w5 - mu) * jax.lax.rsqrt(var + EPS)
    wn = (wn * g_ref[...] + bb_ref[...]) * (1.0 / INC)                # (OUTC, G)

    # dynamic conv as one MXU matmul on im2col patches: (OUTC,G)@(G,HO*WO)
    out = jnp.dot(wn, p_ref[0], precision=hp,
                  preferred_element_type=jnp.float32)                 # (OUTC, HOWO)
    o_ref[0] = out.astype(o_ref.dtype)


# ---------- GLCM texture features (plain JAX glue) ---------------------------
def glcm_features(x, levels=8):
    # TODO(synk): the original GLCM(1) class definition is not provided; this
    # implements a standard distance-1 horizontal GLCM with 6 Haralick features
    # (contrast, dissimilarity, homogeneity, ASM, energy, correlation).
    n = x.shape[0]
    gray = x.mean(axis=1)                                             # (N, H, W)
    gmin = gray.min(axis=(1, 2), keepdims=True)
    gmax = gray.max(axis=(1, 2), keepdims=True)
    norm = (gray - gmin) / (gmax - gmin + 1e-6)
    q = jnp.clip((norm * levels).astype(jnp.int32), 0, levels - 1)
    a = q[:, :, :-1]
    b = q[:, :, 1:]
    idx = (a * levels + b).reshape(n, -1)
    onehot = jax.nn.one_hot(idx, levels * levels, dtype=jnp.float32)
    P = onehot.sum(axis=1)
    P = P / P.sum(axis=1, keepdims=True)
    P = P.reshape(n, levels, levels)
    i = jnp.arange(levels, dtype=jnp.float32)[None, :, None]
    j = jnp.arange(levels, dtype=jnp.float32)[None, None, :]
    contrast = (P * (i - j) ** 2).sum(axis=(1, 2))
    dissim = (P * jnp.abs(i - j)).sum(axis=(1, 2))
    homog = (P / (1.0 + (i - j) ** 2)).sum(axis=(1, 2))
    asm = (P ** 2).sum(axis=(1, 2))
    energy = jnp.sqrt(asm)
    mu_i = (P * i).sum(axis=(1, 2))
    mu_j = (P * j).sum(axis=(1, 2))
    sd_i = jnp.sqrt((P * (i - mu_i[:, None, None]) ** 2).sum(axis=(1, 2)))
    sd_j = jnp.sqrt((P * (j - mu_j[:, None, None]) ** 2).sum(axis=(1, 2)))
    corr = ((P * (i - mu_i[:, None, None]) * (j - mu_j[:, None, None])).sum(axis=(1, 2))
            / (sd_i * sd_j + 1e-6))
    return jnp.stack([contrast, dissim, homog, asm, energy, corr], axis=1)  # (N, 6)


# ---------- full forward ------------------------------------------------------
def glcm_conv1(x, params):
    w1, b1, w2, b2, gamma, beta = params
    feats = glcm_features(x)                                          # (N, 6)
    feats3 = feats.reshape(N, 1, FEAT)

    # pre-split / reshape parameters (cheap XLA prep, done once per call)
    w2r = w2.reshape(HID, OUTC, G).transpose(1, 0, 2)                 # (OUTC, HID, G)
    b2r = b2.reshape(OUTC, G)
    g2 = gamma.reshape(1, G)
    bb2 = beta.reshape(1, G)
    b1r = b1.reshape(1, HID)

    # im2col (transposed): (N, G, HO*WO); g index order = c*K*K + ki*K + kj,
    # matching the OIHW flattening of the per-sample conv weights.
    cols = []
    for c in range(INC):
        for ki in range(K):
            for kj in range(K):
                cols.append(x[:, c, ki:ki + HO, kj:kj + WO].reshape(N, HOWO))
    patches = jnp.stack(cols, axis=1)                                 # (N, G, HOWO)

    out_flat = pl.pallas_call(
        glcm_conv1_fused_kernel,
        out_shape=jax.ShapeDtypeStruct((N, OUTC, HOWO), jnp.float32),
        grid=(N,),
        in_specs=[
            pl.BlockSpec((1, 1, FEAT), lambda n: (n, 0, 0)),          # feats
            pl.BlockSpec((FEAT, HID), lambda n: (0, 0)),              # w1
            pl.BlockSpec((1, HID), lambda n: (0, 0)),                 # b1
            pl.BlockSpec((OUTC, HID, G), lambda n: (0, 0, 0)),        # w2 (split)
            pl.BlockSpec((OUTC, G), lambda n: (0, 0)),                # b2 (split)
            pl.BlockSpec((1, G), lambda n: (0, 0)),                   # LN gamma
            pl.BlockSpec((1, G), lambda n: (0, 0)),                   # LN beta
            pl.BlockSpec((1, G, HOWO), lambda n: (n, 0, 0)),          # im2col patches
        ],
        out_specs=pl.BlockSpec((1, OUTC, HOWO), lambda n: (n, 0, 0)),
        compiler_params=pltpu.CompilerParams(
            dimension_semantics=("parallel",)),
    )(feats3, w1, b1r, w2r, b2r, g2, bb2, patches)

    return out_flat.reshape(N, OUTC, HO, WO)


# ---------- plain-JAX reference (for correctness check) ----------------------
def reference(x, params):
    w1, b1, w2, b2, gamma, beta = params
    feats = glcm_features(x)
    hp = jax.lax.Precision.HIGHEST
    h = jnp.maximum(jnp.dot(feats, w1, precision=hp) + b1, 0.0)
    raw = jnp.dot(h, w2, precision=hp) + b2
    w5 = raw.reshape(N, OUTC, INC, K, K)
    mu = w5.mean(axis=(2, 3, 4), keepdims=True)
    var = ((w5 - mu) ** 2).mean(axis=(2, 3, 4), keepdims=True)
    wn = (w5 - mu) / jnp.sqrt(var + EPS)
    wn = wn * gamma.reshape(1, 1, INC, K, K) + beta.reshape(1, 1, INC, K, K)
    wn = wn / INC
    outs = []
    for i in range(N):
        o = jax.lax.conv_general_dilated(
            x[i:i + 1], wn[i], window_strides=(1, 1), padding="VALID",
            dimension_numbers=("NCHW", "OIHW", "NCHW"), precision=hp)
        outs.append(o)
    return jnp.concatenate(outs, axis=0)


if __name__ == "__main__":
    key = jax.random.PRNGKey(0)
    k1, k2, k3, k4, kx = jax.random.split(key, 5)
    # deterministic synthetic parameters (shapes from Fea2Weight / LayerNorm init)
    w1 = jax.random.normal(k1, (FEAT, HID), jnp.float32) / jnp.sqrt(FEAT)
    b1 = jax.random.normal(k2, (HID,), jnp.float32) * 0.01
    w2 = jax.random.normal(k3, (HID, D), jnp.float32) / jnp.sqrt(HID)
    b2 = jax.random.normal(k4, (D,), jnp.float32) * 0.01
    gamma = jnp.ones((G,), jnp.float32)     # LayerNorm weight init
    beta = jnp.zeros((G,), jnp.float32)     # LayerNorm bias init
    params = (w1, b1, w2, b2, gamma, beta)

    x = jax.random.normal(kx, (N, INC, H, W), jnp.float32)

    out = jax.block_until_ready(glcm_conv1(x, params))
    ref = jax.block_until_ready(reference(x, params))

    assert out.shape == (N, OUTC, HO, WO), out.shape
    np.testing.assert_allclose(np.asarray(out), np.asarray(ref), rtol=1e-3, atol=1e-3)
    print("KERNEL_OK")
</pallas_src>

<mosaic_0001>
module attributes {stable_mosaic.version = 11 : i64} {
  func.func @glcm_conv1_fused_kernel(%arg0: i32, %arg1: memref<1x1x6xf32, #tpu.memory_space<vmem>>, %arg2: memref<6x256xf32, #tpu.memory_space<vmem>>, %arg3: memref<1x256xf32, #tpu.memory_space<vmem>>, %arg4: memref<3x256x36xf32, #tpu.memory_space<vmem>>, %arg5: memref<3x36xf32, #tpu.memory_space<vmem>>, %arg6: memref<1x36xf32, #tpu.memory_space<vmem>>, %arg7: memref<1x36xf32, #tpu.memory_space<vmem>>, %arg8: memref<1x36x196xf32, #tpu.memory_space<vmem>>, %arg9: memref<1x3x196xf32, #tpu.memory_space<vmem>>) attributes {dimension_semantics = [#tpu.dimension_semantics<parallel>], iteration_bounds = array<i64: 2>, scalar_prefetch = 0 : i64, scratch_operands = 0 : i64, tpu.core_type = #tpu.core_type<tc>, window_params = [{transform_indices = @transform_0, window_bounds = array<i64: 1, 1, 6>}, {pipeline_mode = #tpu.pipeline_mode<synchronous>, transform_indices = @transform_1, window_bounds = array<i64: 6, 256>}, {pipeline_mode = #tpu.pipeline_mode<synchronous>, transform_indices = @transform_2, window_bounds = array<i64: 1, 256>}, {pipeline_mode = #tpu.pipeline_mode<synchronous>, transform_indices = @transform_3, window_bounds = array<i64: 3, 256, 36>}, {pipeline_mode = #tpu.pipeline_mode<synchronous>, transform_indices = @transform_4, window_bounds = array<i64: 3, 36>}, {pipeline_mode = #tpu.pipeline_mode<synchronous>, transform_indices = @transform_5, window_bounds = array<i64: 1, 36>}, {pipeline_mode = #tpu.pipeline_mode<synchronous>, transform_indices = @transform_6, window_bounds = array<i64: 1, 36>}, {transform_indices = @transform_7, window_bounds = array<i64: 1, 36, 196>}, {transform_indices = @transform_8, window_bounds = array<i64: 1, 3, 196>}]} {
    %c0 = arith.constant 0 : index
    %c0_0 = arith.constant 0 : index
    %c0_1 = arith.constant 0 : index
    %0 = vector.load %arg1[%c0, %c0_0, %c0_1] : memref<1x1x6xf32, #tpu.memory_space<vmem>>, vector<1x1x6xf32>
    %1 = vector.shape_cast %0 : vector<1x1x6xf32> to vector<1x6xf32>
    %c0_2 = arith.constant 0 : index
    %c0_3 = arith.constant 0 : index
    %2 = vector.load %arg2[%c0_2, %c0_3] : memref<6x256xf32, #tpu.memory_space<vmem>>, vector<6x256xf32>
    %cst = arith.constant dense<0.000000e+00> : vector<1x256xf32>
    %3 = tpu.matmul %1, %2, %cst {dimension_numbers = #tpu.dot_dimension_numbers<[1], [0], [0], [1], [0, 0, 1, 1], [], []>, precision = #tpu.contract_precision<fp32>} : vector<1x6xf32>, vector<6x256xf32>, vector<1x256xf32> -> vector<1x256xf32>
    %c0_4 = arith.constant 0 : index
    %c0_5 = arith.constant 0 : index
    %4 = vector.load %arg3[%c0_4, %c0_5] : memref<1x256xf32, #tpu.memory_space<vmem>>, vector<1x256xf32>
    %5 = arith.addf %3, %4 : vector<1x256xf32>
    %cst_6 = arith.constant 0.000000e+00 : f32
    %6 = vector.broadcast %cst_6 : f32 to vector<1x256xf32>
    %7 = arith.maximumf %5, %6 : vector<1x256xf32>
    %c0_7 = arith.constant 0 : index
    %c0_8 = arith.constant 0 : index
    %c0_9 = arith.constant 0 : index
    %8 = vector.load %arg4[%c0_7, %c0_8, %c0_9] : memref<3x256x36xf32, #tpu.memory_space<vmem>>, vector<1x256x36xf32>
    %9 = vector.shape_cast %8 : vector<1x256x36xf32> to vector<256x36xf32>
    %cst_10 = arith.constant dense<0.000000e+00> : vector<1x36xf32>
    %10 = tpu.matmul %7, %9, %cst_10 {dimension_numbers = #tpu.dot_dimension_numbers<[1], [0], [0], [1], [0, 0, 1, 1], [], []>, precision = #tpu.contract_precision<fp32>} : vector<1x256xf32>, vector<256x36xf32>, vector<1x36xf32> -> vector<1x36xf32>
    %c1 = arith.constant 1 : index
    %c0_11 = arith.constant 0 : index
    %c0_12 = arith.constant 0 : index
    %11 = vector.load %arg4[%c1, %c0_11, %c0_12] : memref<3x256x36xf32, #tpu.memory_space<vmem>>, vector<1x256x36xf32>
    %12 = vector.shape_cast %11 : vector<1x256x36xf32> to vector<256x36xf32>
    %cst_13 = arith.constant dense<0.000000e+00> : vector<1x36xf32>
    %13 = tpu.matmul %7, %12, %cst_13 {dimension_numbers = #tpu.dot_dimension_numbers<[1], [0], [0], [1], [0, 0, 1, 1], [], []>, precision = #tpu.contract_precision<fp32>} : vector<1x256xf32>, vector<256x36xf32>, vector<1x36xf32> -> vector<1x36xf32>
    %c2 = arith.constant 2 : index
    %c0_14 = arith.constant 0 : index
    %c0_15 = arith.constant 0 : index
    %14 = vector.load %arg4[%c2, %c0_14, %c0_15] : memref<3x256x36xf32, #tpu.memory_space<vmem>>, vector<1x256x36xf32>
    %15 = vector.shape_cast %14 : vector<1x256x36xf32> to vector<256x36xf32>
    %cst_16 = arith.constant dense<0.000000e+00> : vector<1x36xf32>
    %16 = tpu.matmul %7, %15, %cst_16 {dimension_numbers = #tpu.dot_dimension_numbers<[1], [0], [0], [1], [0, 0, 1, 1], [], []>, precision = #tpu.contract_precision<fp32>} : vector<1x256xf32>, vector<256x36xf32>, vector<1x36xf32> -> vector<1x36xf32>
    %17 = tpu.concatenate %10, %13, %16 in 0 : vector<1x36xf32>, vector<1x36xf32>, vector<1x36xf32> -> vector<3x36xf32>
    %c0_17 = arith.constant 0 : index
    %c0_18 = arith.constant 0 : index
    %18 = vector.load %arg5[%c0_17, %c0_18] : memref<3x36xf32, #tpu.memory_space<vmem>>, vector<3x36xf32>
    %19 = arith.addf %17, %18 : vector<3x36xf32>
    %cst_19 = arith.constant dense<0.000000e+00> : vector<3xf32>
    %20 = vector.multi_reduction <add>, %19, %cst_19 [1] : vector<3x36xf32> to vector<3xf32>
    %21 = vector.shape_cast %20 : vector<3xf32> to vector<3x1xf32>
    %cst_20 = arith.constant 3.600000e+01 : f32
    %22 = vector.broadcast %cst_20 : f32 to vector<3x1xf32>
    %23 = arith.divf %21, %22 : vector<3x1xf32>
    %24 = vector.broadcast %23 : vector<3x1xf32> to vector<3x36xf32>
    %25 = arith.subf %19, %24 : vector<3x36xf32>
    %26 = arith.mulf %25, %25 : vector<3x36xf32>
    %cst_21 = arith.constant dense<0.000000e+00> : vector<3xf32>
    %27 = vector.multi_reduction <add>, %26, %cst_21 [1] : vector<3x36xf32> to vector<3xf32>
    %28 = vector.shape_cast %27 : vector<3xf32> to vector<3x1xf32>
    %cst_22 = arith.constant 3.600000e+01 : f32
    %29 = vector.broadcast %cst_22 : f32 to vector<3x1xf32>
    %30 = arith.divf %28, %29 : vector<3x1xf32>
    %31 = vector.broadcast %23 : vector<3x1xf32> to vector<3x36xf32>
    %32 = arith.subf %19, %31 : vector<3x36xf32>
    %cst_23 = arith.constant 9.99999974E-6 : f32
    %33 = vector.broadcast %cst_23 : f32 to vector<3x1xf32>
    %34 = arith.addf %30, %33 : vector<3x1xf32>
    %35 = math.rsqrt %34 : vector<3x1xf32>
    %36 = vector.broadcast %35 : vector<3x1xf32> to vector<3x36xf32>
    %37 = arith.mulf %32, %36 : vector<3x36xf32>
    %c0_24 = arith.constant 0 : index
    %c0_25 = arith.constant 0 : index
    %38 = vector.load %arg6[%c0_24, %c0_25] : memref<1x36xf32, #tpu.memory_space<vmem>>, vector<1x36xf32>
    %39 = vector.broadcast %38 : vector<1x36xf32> to vector<3x36xf32>
    %40 = arith.mulf %37, %39 : vector<3x36xf32>
    %c0_26 = arith.constant 0 : index
    %c0_27 = arith.constant 0 : index
    %41 = vector.load %arg7[%c0_26, %c0_27] : memref<1x36xf32, #tpu.memory_space<vmem>>, vector<1x36xf32>
    %42 = vector.broadcast %41 : vector<1x36xf32> to vector<3x36xf32>
    %43 = arith.addf %40, %42 : vector<3x36xf32>
    %cst_28 = arith.constant 2.500000e-01 : f32
    %44 = vector.broadcast %cst_28 : f32 to vector<3x36xf32>
    %45 = arith.mulf %43, %44 : vector<3x36xf32>
    %c0_29 = arith.constant 0 : index
    %c0_30 = arith.constant 0 : index
    %c0_31 = arith.constant 0 : index
    %46 = vector.load %arg8[%c0_29, %c0_30, %c0_31] : memref<1x36x196xf32, #tpu.memory_space<vmem>>, vector<1x36x196xf32>
    %47 = vector.shape_cast %46 : vector<1x36x196xf32> to vector<36x196xf32>
    %cst_32 = arith.constant dense<0.000000e+00> : vector<3x196xf32>
    %48 = tpu.matmul %45, %47, %cst_32 {dimension_numbers = #tpu.dot_dimension_numbers<[1], [0], [0], [1], [0, 0, 1, 1], [], []>, precision = #tpu.contract_precision<fp32>} : vector<3x36xf32>, vector<36x196xf32>, vector<3x196xf32> -> vector<3x196xf32>
    %c0_33 = arith.constant 0 : index
    %c0_34 = arith.constant 0 : index
    %c0_35 = arith.constant 0 : index
    %49 = vector.load %arg9[%c0_33, %c0_34, %c0_35] : memref<1x3x196xf32, #tpu.memory_space<vmem>>, vector<1x3x196xf32>
    %50 = vector.shape_cast %49 : vector<1x3x196xf32> to vector<3x196xf32>
    %51 = vector.shape_cast %48 : vector<3x196xf32> to vector<1x3x196xf32>
    tpu.vector_store %arg9[%c0_33, %c0_34, %c0_35], %51 {strides = array<i32>} : memref<1x3x196xf32, #tpu.memory_space<vmem>>, vector<1x3x196xf32>,
    return
  }
  func.func @transform_0(%arg0: i32) -> (i32, i32, i32) {
    %c0_i32 = arith.constant 0 : i32
    %c0_i32_0 = arith.constant 0 : i32
    %c0_i32_1 = arith.constant 0 : i32
    return %arg0, %c0_i32, %c0_i32_0 : i32, i32, i32
  }
  func.func @transform_1(%arg0: i32) -> (i32, i32) {
    %c0_i32 = arith.constant 0 : i32
    %c0_i32_0 = arith.constant 0 : i32
    %c0_i32_1 = arith.constant 0 : i32
    return %c0_i32, %c0_i32_0 : i32, i32
  }
  func.func @transform_2(%arg0: i32) -> (i32, i32) {
    %c0_i32 = arith.constant 0 : i32
    %c0_i32_0 = arith.constant 0 : i32
    %c0_i32_1 = arith.constant 0 : i32
    return %c0_i32, %c0_i32_0 : i32, i32
  }
  func.func @transform_3(%arg0: i32) -> (i32, i32, i32) {
    %c0_i32 = arith.constant 0 : i32
    %c0_i32_0 = arith.constant 0 : i32
    %c0_i32_1 = arith.constant 0 : i32
    %c0_i32_2 = arith.constant 0 : i32
    return %c0_i32, %c0_i32_0, %c0_i32_1 : i32, i32, i32
  }
  func.func @transform_4(%arg0: i32) -> (i32, i32) {
    %c0_i32 = arith.constant 0 : i32
    %c0_i32_0 = arith.constant 0 : i32
    %c0_i32_1 = arith.constant 0 : i32
    return %c0_i32, %c0_i32_0 : i32, i32
  }
  func.func @transform_5(%arg0: i32) -> (i32, i32) {
    %c0_i32 = arith.constant 0 : i32
    %c0_i32_0 = arith.constant 0 : i32
    %c0_i32_1 = arith.constant 0 : i32
    return %c0_i32, %c0_i32_0 : i32, i32
  }
  func.func @transform_6(%arg0: i32) -> (i32, i32) {
    %c0_i32 = arith.constant 0 : i32
    %c0_i32_0 = arith.constant 0 : i32
    %c0_i32_1 = arith.constant 0 : i32
    return %c0_i32, %c0_i32_0 : i32, i32
  }
  func.func @transform_7(%arg0: i32) -> (i32, i32, i32) {
    %c0_i32 = arith.constant 0 : i32
    %c0_i32_0 = arith.constant 0 : i32
    %c0_i32_1 = arith.constant 0 : i32
    return %arg0, %c0_i32, %c0_i32_0 : i32, i32, i32
  }
  func.func @transform_8(%arg0: i32) -> (i32, i32, i32) {
    %c0_i32 = arith.constant 0 : i32
    %c0_i32_0 = arith.constant 0 : i32
    %c0_i32_1 = arith.constant 0 : i32
    return %arg0, %c0_i32, %c0_i32_0 : i32, i32, i32
  }
}

</mosaic_0001>

<bundles_post_ra>
// kernel: tpu_custom_call.1
= control target key start
LH: loop header
LB: loop body
LE: loop exit
PB: predicated region body
PF: predicated region fallthrough
CT: control target
= control target key end

     0   :  { %s3466_s27 = smov 0   ;;  %s5436_s0 = inlined_call_operand.vmem [shape: f32[2,1,6], index: 0, kind: input, shape index: {}]   ;;  %s5437_s1 = inlined_call_operand.vmem [shape: f32[6,256], index: 1, kind: input, shape index: {}]   ;;  %s5438_s2 = inlined_call_operand.vmem [shape: f32[1,256], index: 2, kind: input, shape index: {}]   ;;  %s5439_s3 = inlined_call_operand.vmem [shape: f32[3,256,36], index: 3, kind: input, shape index: {}]   ;;  %s5440_s4 = inlined_call_operand.vmem [shape: f32[3,36], index: 4, kind: input, shape index: {}]   ;;  %s5441_s5 = inlined_call_operand.vmem [shape: f32[1,36], index: 5, kind: input, shape index: {}]   ;;  %s5442_s6 = inlined_call_operand.vmem [shape: f32[1,36], index: 6, kind: input, shape index: {}]   ;;  %s5443_s7 = inlined_call_operand.vmem [shape: f32[2,36,196], index: 7, kind: input, shape index: {}]   ;;  %s5444_s8 = inlined_call_operand.vmem [shape: f32[2,3,196], index: 8, kind: output, shape index: {}]  }
   0x1 LB: > { %s3321_s28 = sadd.s32 4294967295, %s3418_s27   ;;  %p3325_p0 = scmp.ge.s32.totalorder %s3418_s27, 1  ;;  %s3418_s27 = sphi %s3466_s27, %s18_s27  }
   0x2   : > { %p270_p1 = scmp.lt.s32.totalorder %s3418_s27, 3 }
   0x4   : > { %p271_p2 = pnand %p3325_p0, %p270_p1 }
   0x6   : > { %274 = sbr.rel (%p271_p2) target bundleno = 991 (0x3df), region = 52 }
   0xb   : > { %v321_v0 = vld [vmem:[%s5437_s1] sm:$0x3f]  ;;  %v322_v1 = vld [vmem:[%s5437_s1 + $0x8] sm:$0x3f]  ;;  %vm333_vm0 = vcmask 1045504   ;;  %p307_p3 = scmp.lt.s32.totalorder %s3321_s28, 1 }
   0xc   : > { %v335_v2 = vsel %vm333_vm0, %v321_v0, 0  ;;  %v338_v3 = vsel %vm333_vm0, %v322_v1, 0  ;;  %v649_v4 = vld [vmem:[%s5439_s3 + $0x78] sm:$0xff]  ;;  %v648_v5 = vld [vmem:[%s5439_s3 + $0x70] sm:$0xff]  ;;  %v647_v9 = vld [vmem:[%s5439_s3 + $0x68] sm:$0xff]  ;;  %vm329_vm1 = vcmask 48128  }
   0xd   : > { %v355_v6 = vand.u32 4294901760, %v335_v2  ;;  %s5609_s28 = smov (!%p307_p3, %s3321_s28), 1  ;;  %v501_v7 = vand.u32 4294901760, %v338_v3  ;;  %v3488_v8 = vand.u32 4294901760, %v649_v4  ;;  %v3497_v12 = vand.u32 4294901760, %v648_v5  ;;  %v646_v15 = vld [vmem:[%s5439_s3 + $0x60] sm:$0xff] }
   0xe   : > { %s309_s19 = scalar_lea.vmem %s5436_s0, %s5609_s28  ;;  %v3499_v14 = vand.u32 4294901760, %v647_v9  ;;  %v645_v21 = vld [vmem:[%s5439_s3 + $0x58] sm:$0xff]  ;;  %v3515_v25 = vand.u32 4294901760, %v646_v15  ;;  %v644_v28 = vld [vmem:[%s5439_s3 + $0x50] sm:$0xff]  ;;  %v643_v34 = vld [vmem:[%s5439_s3 + $0x48] sm:$0xff]  ;;  %vm2784_vm2 = vcmask 1040384  }
   0xf   : > { %v382_v10 = vsub.f32 %v335_v2, %v355_v6  ;;  %356 = vmatpush.msra.mxu0 %v355_v6  ;;  %432 = vmatpush.msra.mxu3 %v355_v6  ;;  %v528_v11 = vsub.f32 %v338_v3, %v501_v7  ;;  %v320_v13 = vld [vmem:[%s309_s19] sm:$0x1]  ;;  %v3505_v19 = vsub.f32 %v649_v4, %v3488_v8  ;;  %v3527_v32 = vand.u32 4294901760, %v645_v21  ;;  %v641_v45 = vld [vmem:[%s5439_s3 + $0x38] sm:$0xff]  ;;  %v640_v50 = vld [vmem:[%s5439_s3 + $0x30] sm:$0xff]  ;;  %s3396_s10 = smul.u32 80, %s5609_s28 }
  0x10   : > { %v331_v16 = vsel %vm329_vm1, %v320_v13, 0  ;;  %v3513_v24 = vsub.f32 %v648_v5, %v3497_v12  ;;  %v3521_v27 = vsub.f32 %v647_v9, %v3499_v14  ;;  %v3538_v36 = vsub.f32 %v646_v15, %v3515_v25  ;;  %v642_v40 = vld [vmem:[%s5439_s3 + $0x40] sm:$0xff]  ;;  %v639_v56 = vld [vmem:[%s5439_s3 + $0x28] sm:$0xff]  ;;  %v637_v5 = vld [vmem:[%s5439_s3 + $0x18] sm:$0xff]  ;;  %s3395_s18 = sshll.u32 %s5609_s28, 3 }
  0x11   : > { %409 = vmatpush.msra.mxu2 %v382_v10  ;;  %v383_v17 = vand.u32 4294901760, %v382_v10  ;;  %v529_v18 = vand.u32 4294901760, %v528_v11  ;;  %v3507_v20 = vand.u32 4294901760, %v331_v16  ;;  %v709_v31 = vand.u32 4294901760, %v3505_v19  ;;  %v638_v63 = vld [vmem:[%s5439_s3 + $0x20] sm:$0xff]  ;;  %v636_v13 = vld [vmem:[%s5439_s3 + $0x10] sm:$0xff]  ;;  %s5313_s13 = scalar_lea.vmem %s5443_s7, %s3396_s10  ;;  %s319_s21 = scalar_lea.vmem %s5444_s8, %s3395_s18 }
  0x12   : > { %v715_v35 = vand.u32 4294901760, %v3513_v24  ;;  %v3540_v37 = vand.u32 4294901760, %v644_v28  ;;  %v721_v39 = vand.u32 4294901760, %v3521_v27  ;;  %v3554_v42 = vsub.f32 %v645_v21, %v3527_v32 }
  0x13   : > { %502 = vmatpush.msrb.mxu2 %v501_v7  ;;  %v384_v22 = vsub.f32 %v382_v10, %v383_v17  ;;  %458 = vmatpush.msrb.mxu0 %v383_v17  ;;  %v530_v23 = vsub.f32 %v528_v11, %v529_v18  ;;  %v3518_v26 = vsub.f32 %v331_v16, %v3507_v20  ;;  %v3556_v43 = vand.u32 4294901760, %v643_v34 }
  0x14   : > { %v710_v41 = vsub.f32 %v3505_v19, %v709_v31  ;;  %v716_v46 = vsub.f32 %v3513_v24, %v715_v35  ;;  %v727_v47 = vand.u32 4294901760, %v3538_v36  ;;  %v3566_v48 = vsub.f32 %v644_v28, %v3540_v37 }
  0x15   : > { %v385_v29 = vand.u32 4294901760, %v384_v22  ;;  %v531_v30 = vand.u32 4294901760, %v530_v23  ;;  %412 = vmatmul.f32.vlgmr.msra.gmra.mxu2 %v3518_v26  ;;  %v3531_v33 = vand.u32 4294901760, %v3518_v26  ;;  %v3568_v49 = vand.u32 4294901760, %v642_v40  ;;  %v635_v22 = vld [vmem:[%s5439_s3 + $0x8] sm:$0xff] }
  0x16   : > { %604 = vmatpush.msra.mxu2 %v529_v18  ;;  %v722_v51 = vsub.f32 %v3521_v27, %v721_v39  ;;  %v711_v52 = vand.u32 4294901760, %v710_v41  ;;  %v733_v53 = vand.u32 4294901760, %v3554_v42  ;;  %v3578_v54 = vsub.f32 %v643_v34, %v3556_v43 }
  0x17   : > { %386 = vmatpush.msra.mxu1 %v385_v29  ;;  %532 = vmatpush.msrb.mxu3 %v531_v30  ;;  %v360_v38 = vsub.f32 %v3518_v26, %v3531_v33  ;;  %v3580_v55 = vand.u32 4294901760, %v641_v45  ;;  %v3585_v57 = vand.u32 4294901760, %v640_v50  ;;  %v717_v58 = vand.u32 4294901760, %v716_v46 }
  0x18   : > { %436 = vmatmul.f32.vlgmr.msra.gmra.mxu3 %v3531_v33  ;;  %388 = vmatmul.f32.vlgmr.msra.gmra.mxu1 %v3507_v20  ;;  %v728_v59 = vsub.f32 %v3538_v36, %v727_v47  ;;  %v739_v60 = vand.u32 4294901760, %v3566_v48  ;;  %v3593_v61 = vsub.f32 %v642_v40, %v3568_v49  ;;  %v3597_v62 = vand.u32 4294901760, %v639_v56 }
  0x19   : > { %480 = vmatpush.msrb.mxu1 %v355_v6  ;;  %v361_v44 = vand.u32 4294901760, %v360_v38  ;;  %626 = vmatpush.msra.mxu3 %v501_v7  ;;  %v723_v0 = vand.u32 4294901760, %v722_v51  ;;  %v734_v1 = vsub.f32 %v3554_v42, %v733_v53  ;;  %v745_v2 = vand.u32 4294901760, %v3578_v54  ;;  %v634_v38 = vld [vmem:[%s5439_s3] sm:$0xff] }
  0x1a   : > { %v3608_v3 = vsub.f32 %v641_v45, %v3580_v55  ;;  %v3612_v4 = vsub.f32 %v640_v50, %v3585_v57  ;;  %v729_v6 = vand.u32 4294901760, %v728_v59  ;;  %v751_v9 = vand.u32 4294901760, %v3593_v61 }
  0x1b   : > { %578 = vmatpush.msra.mxu1 %v501_v7  ;;  %362 = vmatmul.f32.vlgmr.msra.gmra.mxu0 %v361_v44  ;;  %v740_v7 = vsub.f32 %v3566_v48, %v739_v60  ;;  %v3622_v10 = vand.u32 4294901760, %v638_v63  ;;  %v735_v15 = vand.u32 4294901760, %v734_v1  ;;  %v746_v16 = vsub.f32 %v3578_v54, %v745_v2 }
  0x1c   : > { %555 = vmatpush.msra.mxu0 %v528_v11  ;;  %v3627_v11 = vsub.f32 %v639_v56, %v3597_v62  ;;  %v757_v17 = vand.u32 4294901760, %v3608_v3  ;;  %v3637_v18 = vand.u32 4294901760, %v637_v5  ;;  %v763_v21 = vand.u32 4294901760, %v3612_v4 }
  0x1d   : > { %508 = vmatmul.f32.vlgmr.msrb.gmra.mxu2 %v361_v44  ;;  %v741_v23 = vand.u32 4294901760, %v740_v7  ;;  %v752_v28 = vsub.f32 %v3593_v61, %v751_v9  ;;  %v3650_v29 = vsub.f32 %v638_v63, %v3622_v10  ;;  %v3652_v30 = vand.u32 4294901760, %v636_v13 }
  0x1e   : > { %810 = vmatpush.msrb.mxu2 %v3505_v19  ;;  %v769_v34 = vand.u32 4294901760, %v3627_v11  ;;  %v747_v40 = vand.u32 4294901760, %v746_v16  ;;  %v758_v41 = vsub.f32 %v3608_v3, %v757_v17  ;;  %v3665_v44 = vsub.f32 %v637_v5, %v3637_v18 }
  0x1f   : > { %v753_v45 = vand.u32 4294901760, %v752_v28  ;;  %v775_v46 = vand.u32 4294901760, %v3650_v29  ;;  %v3677_v50 = vsub.f32 %v636_v13, %v3652_v30  ;;  %v3679_v51 = vand.u32 4294901760, %v634_v38 }
  0x20   : > { %534 = vmatmul.f32.vlgmr.msrb.gmra.mxu3 %v3507_v20  ;;  %482 = vmatmul.f32.vlgmr.msrb.gmra.mxu1 %v3507_v20  ;;  %v770_v56 = vsub.f32 %v3627_v11, %v769_v34  ;;  %vm2786_vm3 = vcmask 1041408   ;;  %vm2790_vm4 = vcmask 288768   ;;  %vm2845_vm6 = vcmask 1043456  }
  0x21   : > { %712 = vmatpush.msrb.mxu1 %v711_v52  ;;  %813 = vmatpush.msrb.mxu2 %v3513_v24  ;;  %v759_v52 = vand.u32 4294901760, %v758_v41  ;;  %v5446_v1 = vand.u32 4294901760, %v3677_v50  ;;  %v3702_v5 = vsub.f32 %v634_v38, %v3679_v51  ;;  %v662_v41 = vld [vmem:[%s5439_s3 + $0xe0] sm:$0xff]  ;;  %v5513_v24 = vand.u32 4294901760, %v3677_v50 }
  0x22   : > { %863 = vmatpush.msrb.mxu3 %v3488_v8  ;;  %v771_v7 = vand.u32 4294901760, %v770_v56  ;;  %vm2841_vm10 = vcmask 293888   ;;  %vm3253_vm11 = vcmask 1042432   ;;  %vm3254_vm12 = vcmask 555012  }
  0x23   : > { %718 = vmatpush.msrb.mxu1 %v717_v58  ;;  %816 = vmatpush.msrb.mxu2 %v3521_v27  ;;  %v781_v58 = vand.u32 4294901760, %v3665_v44  ;;  %v788_v28 = vsub.f32 %v3677_v50, %v5446_v1  ;;  %v5447_v38 = vand.u32 4294901760, %v3702_v5  ;;  %v5515_v27 = vand.u32 4294901760, %v3702_v5  ;;  %vm3255_vm13 = vmor %vm3254_vm12, %vm3253_vm11 }
  0x24   : > { %460 = vmatmul.f32.vlgmr.msrb.gmra.mxu0 %v3507_v20  ;;  %865 = vmatpush.msrb.mxu3 %v3497_v12 }
  0x25   : > { %724 = vmatpush.msrb.mxu1 %v723_v0  ;;  %667 = vmatpush.msrb.mxu0 %v3488_v8  ;;  %v776_v0 = vsub.f32 %v3650_v29, %v775_v46  ;;  %v782_v13 = vsub.f32 %v3665_v44, %v781_v58 }
  0x26   : > { %606 = vmatmul.f32.vlgmr.msra.gmra.mxu2 %v3507_v20  ;;  %867 = vmatpush.msrb.mxu3 %v3499_v14 }
  0x27   : > { %730 = vmatpush.msrb.mxu1 %v729_v6  ;;  %819 = vmatpush.msrb.mxu2 %v3538_v36  ;;  %v664_v6 = vld [vmem:[%s5439_s3 + $0xf0] sm:$0xff]  ;;  %v658_v36 = vld [vmem:[%s5439_s3 + $0xc0] sm:$0xff] }
  0x28   : > { %628 = vmatmul.f32.vlgmr.msra.gmra.mxu3 %v3507_v20  ;;  %582 = vmatmul.f32.vlgmr.msra.gmra.mxu1 %v3531_v33  ;;  %v3667_v20 = vand.u32 4294901760, %v635_v22  ;;  %v764_v33 = vsub.f32 %v3612_v4, %v763_v21 }
  0x29   : > { %736 = vmatpush.msrb.mxu1 %v735_v15  ;;  %669 = vmatpush.msrb.mxu0 %v3497_v12 }
  0x2a   : > { %822 = vmatpush.msrb.mxu2 %v3554_v42  ;;  %869 = vmatpush.msrb.mxu3 %v3515_v25  ;;  %v3689_v59 = vsub.f32 %v635_v22, %v3667_v20  ;;  %v765_v63 = vand.u32 4294901760, %v764_v33  ;;  %v663_v22 = vld [vmem:[%s5439_s3 + $0xe8] sm:$0xff]  ;;  %v783_v33 = vand.u32 4294901760, %v782_v13  ;;  %v3754_v13 = vand.u32 4294901760, %v662_v41 }
  0x2b   : > { %742 = vmatpush.msrb.mxu1 %v741_v23  ;;  %671 = vmatpush.msrb.mxu0 %v3499_v14  ;;  %v777_v23 = vand.u32 4294901760, %v776_v0  ;;  %v3740_v56 = vand.u32 4294901760, %v663_v22  ;;  %v789_v0 = vand.u32 4294901760, %v788_v28 }
  0x2c   : > { %558 = vmatmul.f32.vlgmr.msra.gmra.mxu0 %v3518_v26  ;;  %825 = vmatpush.msrb.mxu2 %v3566_v48  ;;  %v665_v26 = vld [vmem:[%s5439_s3 + $0xf8] sm:$0xff]  ;;  %v5445_v15 = vand.u32 4294901760, %v3689_v59 }
  0x2d   : > { %748 = vmatpush.msrb.mxu1 %v747_v40  ;;  %871 = vmatpush.msrb.mxu3 %v3527_v32  ;;  %v3714_v16 = vand.u32 4294901760, %v665_v26  ;;  %v3726_v40 = vand.u32 4294901760, %v664_v6  ;;  %v3761_v28 = vsub.f32 %v663_v22, %v3740_v56 }
  0x2e   : > { %673 = vmatpush.msrb.mxu0 %v3515_v25  ;;  %828 = vmatpush.msrb.mxu2 %v3578_v54  ;;  %v656_v54 = vld [vmem:[%s5439_s3 + $0xb0] sm:$0xff] }
  0x2f   : > { %754 = vmatpush.msrb.mxu1 %v753_v45  ;;  %873 = vmatpush.msrb.mxu3 %v3540_v37  ;;  %v794_v45 = vsub.f32 %v3689_v59, %v5445_v15 }
  0x30   : > { %675 = vmatpush.msrb.mxu0 %v3527_v32  ;;  %831 = vmatpush.msrb.mxu2 %v3593_v61  ;;  %v3904_v61 = vand.u32 4294901760, %v656_v54 }
  0x31   : > { %760 = vmatpush.msrb.mxu1 %v759_v52  ;;  %875 = vmatpush.msrb.mxu3 %v3556_v43  ;;  %v3738_v52 = vsub.f32 %v665_v26, %v3714_v16  ;;  %v3752_v26 = vsub.f32 %v664_v6, %v3726_v40 }
  0x32   : > { %677 = vmatpush.msrb.mxu0 %v3540_v37  ;;  %834 = vmatpush.msrb.mxu2 %v3608_v3 }
  0x33   : > { %766 = vmatpush.msrb.mxu1 %v765_v63  ;;  %877 = vmatpush.msrb.mxu3 %v3568_v49  ;;  %v661_v63 = vld [vmem:[%s5439_s3 + $0xd8] sm:$0xff]  ;;  %v1050_v15 = vand.u32 4294901760, %v3738_v52 }
  0x34   : > { %679 = vmatpush.msrb.mxu0 %v3556_v43  ;;  %837 = vmatpush.msrb.mxu2 %v3612_v4  ;;  %v3763_v1 = vand.u32 4294901760, %v661_v63 }
  0x35   : > { %772 = vmatpush.msrb.mxu1 %v771_v7  ;;  %879 = vmatpush.msrb.mxu3 %v3580_v55  ;;  %v800_v7 = vsub.f32 %v3702_v5, %v5447_v38  ;;  %v3770_v38 = vsub.f32 %v662_v41, %v3754_v13  ;;  %v1051_v22 = vsub.f32 %v3738_v52, %v1050_v15 }
  0x36   : > { %681 = vmatpush.msrb.mxu0 %v3568_v49  ;;  %840 = vmatpush.msrb.mxu2 %v3627_v11 }
  0x37   : > { %778 = vmatpush.msrb.mxu1 %v777_v23  ;;  %881 = vmatpush.msrb.mxu3 %v3585_v57  ;;  %v795_v23 = vand.u32 4294901760, %v794_v45  ;;  %v801_v6 = vand.u32 4294901760, %v800_v7  ;;  %v1062_v45 = vand.u32 4294901760, %v3761_v28  ;;  %v1068_v7 = vand.u32 4294901760, %v3770_v38 }
  0x38   : > { %683 = vmatpush.msrb.mxu0 %v3580_v55  ;;  %843 = vmatpush.msrb.mxu2 %v3650_v29 }
  0x39   : > { %784 = vmatpush.msrb.mxu1 %v783_v33  ;;  %883 = vmatpush.msrb.mxu3 %v3597_v62  ;;  %v5448_v33 = vand.u32 4294901760, %v3752_v26 }
  0x3a   : > { %685 = vmatpush.msrb.mxu0 %v3585_v57  ;;  %846 = vmatpush.msrb.mxu2 %v3665_v44  ;;  %v653_v44 = vld [vmem:[%s5439_s3 + $0x98] sm:$0xff] }
  0x3b   : > { %790 = vmatpush.msrb.mxu1 %v789_v0  ;;  %885 = vmatpush.msrb.mxu3 %v3622_v10  ;;  %v3780_v0 = vsub.f32 %v661_v63, %v3763_v1  ;;  %v1057_v41 = vsub.f32 %v3752_v26, %v5448_v33  ;;  %v1052_v63 = vand.u32 4294901760, %v1051_v22  ;;  %v1069_v33 = vsub.f32 %v3770_v38, %v1068_v7 }
  0x3c   : > { %687 = vmatpush.msrb.mxu0 %v3597_v62  ;;  %849 = vmatpush.msrb.mxu2 %v3677_v50  ;;  %v3943_v50 = vand.u32 4294901760, %v653_v44 }
  0x3d   : > { %796 = vmatpush.msrb.mxu1 %v795_v23  ;;  %887 = vmatpush.msrb.mxu3 %v3637_v18  ;;  %v1063_v23 = vsub.f32 %v3761_v28, %v1062_v45 }
  0x3e   : > { %689 = vmatpush.msrb.mxu0 %v3622_v10  ;;  %852 = vmatpush.msrb.mxu2 %v3689_v59 }
  0x3f   : > { %802 = vmatpush.msrb.mxu1 %v801_v6  ;;  %889 = vmatpush.msrb.mxu3 %v3652_v30  ;;  %v1074_v6 = vand.u32 4294901760, %v3780_v0  ;;  %v1064_v22 = vand.u32 4294901760, %v1063_v23 }
  0x40   : > { %691 = vmatpush.msrb.mxu0 %v3637_v18  ;;  %855 = vmatpush.msrb.mxu2 %v3702_v5 }
  0x41   : > { %971 = vmatpush.msra.mxu1 %v3488_v8  ;;  %891 = vmatpush.msrb.mxu3 %v3667_v20  ;;  %v1058_v8 = vand.u32 4294901760, %v1057_v41  ;;  %v1070_v41 = vand.u32 4294901760, %v1069_v33 }
  0x42   : > { %1008 = vmatpush.msra.mxu2 %v3714_v16  ;;  %693 = vmatpush.msrb.mxu0 %v3652_v30 }
  0x43   : > { %973 = vmatpush.msra.mxu1 %v3497_v12  ;;  %893 = vmatpush.msrb.mxu3 %v3679_v51  ;;  %v1075_v12 = vsub.f32 %v3780_v0, %v1074_v6 }
  0x44   : > { %1010 = vmatpush.msra.mxu2 %v3726_v40  ;;  %695 = vmatpush.msrb.mxu0 %v3667_v20 }
  0x45   : > { %975 = vmatpush.msra.mxu1 %v3499_v14  ;;  %1053 = vmatpush.msra.mxu3 %v1052_v63  ;;  %v660_v14 = vld [vmem:[%s5439_s3 + $0xd0] sm:$0xff]  ;;  %v1076_v63 = vand.u32 4294901760, %v1075_v12  ;;  %v651_v12 = vld [vmem:[%s5439_s3 + $0x88] sm:$0xff] }
  0x46   : > { %1012 = vmatpush.msra.mxu2 %v3740_v56  ;;  %697 = vmatpush.msrb.mxu0 %v3679_v51  ;;  %v3824_v19 = vand.u32 4294901760, %v660_v14 }
  0x47   : > { %977 = vmatpush.msra.mxu1 %v3515_v25  ;;  %1059 = vmatpush.msra.mxu3 %v1058_v8  ;;  %v5514_v25 = vand.u32 4294901760, %v3689_v59  ;;  %v652_v59 = vld [vmem:[%s5439_s3 + $0x90] sm:$0xff] }
  0x48   : > { %904 = vmatpush.msra.mxu0 %v709_v31  ;;  %1014 = vmatpush.msra.mxu2 %v3754_v13  ;;  %v659_v31 = vld [vmem:[%s5439_s3 + $0xc8] sm:$0xff]  ;;  %v3956_v8 = vand.u32 4294901760, %v652_v59 }
  0x49   : > { %979 = vmatpush.msra.mxu1 %v3527_v32  ;;  %1065 = vmatpush.msra.mxu3 %v1064_v22  ;;  %v3868_v32 = vand.u32 4294901760, %v659_v31  ;;  %v3959_v22 = vsub.f32 %v653_v44, %v3943_v50 }
  0x4a   : > { %908 = vmatpush.msra.mxu0 %v715_v35  ;;  %1016 = vmatpush.msra.mxu2 %v3763_v1  ;;  %v3871_v35 = vsub.f32 %v660_v14, %v3824_v19 }
  0x4b   : > { %981 = vmatpush.msra.mxu1 %v3540_v37  ;;  %1071 = vmatpush.msra.mxu3 %v1070_v41  ;;  %v3881_v42 = vsub.f32 %v659_v31, %v3868_v32 }
  0x4c   : > { %912 = vmatpush.msra.mxu0 %v721_v39  ;;  %1018 = vmatpush.msra.mxu2 %v3824_v19  ;;  %v1080_v37 = vand.u32 4294901760, %v3871_v35  ;;  %v3878_v39 = vand.u32 4294901760, %v658_v36 }
  0x4d   : > { %983 = vmatpush.msra.mxu1 %v3556_v43  ;;  %1077 = vmatpush.msra.mxu3 %v1076_v63  ;;  %v657_v43 = vld [vmem:[%s5439_s3 + $0xb8] sm:$0xff]  ;;  %v1086_v48 = vand.u32 4294901760, %v3881_v42  ;;  %v3968_v63 = vand.u32 4294901760, %v651_v12 }
  0x4e   : > { %916 = vmatpush.msra.mxu0 %v727_v47  ;;  %1020 = vmatpush.msra.mxu2 %v3868_v32  ;;  %v1081_v47 = vsub.f32 %v3871_v35, %v1080_v37 }
  0x4f   : > { %985 = vmatpush.msra.mxu1 %v3568_v49  ;;  %v3891_v49 = vand.u32 4294901760, %v657_v43 }
  0x50   : > { %920 = vmatpush.msra.mxu0 %v733_v53  ;;  %1022 = vmatpush.msra.mxu2 %v3878_v39  ;;  %v3894_v53 = vsub.f32 %v658_v36, %v3878_v39  ;;  %v650_v36 = vld [vmem:[%s5439_s3 + $0x80] sm:$0xff] }
  0x51   : > { %987 = vmatpush.msra.mxu1 %v3580_v55  ;;  %v1082_v55 = vand.u32 4294901760, %v1081_v47  ;;  %v3982_v47 = vand.u32 4294901760, %v650_v36 }
  0x52   : > { %924 = vmatpush.msra.mxu0 %v739_v60  ;;  %1024 = vmatpush.msra.mxu2 %v3891_v49  ;;  %v1092_v60 = vand.u32 4294901760, %v3894_v53 }
  0x53   : > { %989 = vmatpush.msra.mxu1 %v3585_v57  ;;  %v1087_v57 = vsub.f32 %v3881_v42, %v1086_v48  ;;  %1083 = vmatpush.msra.mxu3 %v1082_v55 }
  0x54   : > { %928 = vmatpush.msra.mxu0 %v745_v2  ;;  %v655_v2 = vld [vmem:[%s5439_s3 + $0xa8] sm:$0xff]  ;;  %v1093_v4 = vsub.f32 %v3894_v53, %v1092_v60  ;;  %1026 = vmatpush.msra.mxu2 %v3904_v61 }
  0x55   : > { %991 = vmatpush.msra.mxu1 %v3597_v62  ;;  %v3907_v62 = vsub.f32 %v657_v43, %v3891_v49  ;;  %v1088_v3 = vand.u32 4294901760, %v1087_v57 }
  0x56   : > { %932 = vmatpush.msra.mxu0 %v751_v9  ;;  %v3916_v9 = vand.u32 4294901760, %v655_v2 }
  0x57   : > { %993 = vmatpush.msra.mxu1 %v3622_v10  ;;  %v3919_v10 = vsub.f32 %v656_v54, %v3904_v61  ;;  %v1098_v11 = vand.u32 4294901760, %v3907_v62  ;;  %1089 = vmatpush.msra.mxu3 %v1088_v3  ;;  %v3985_v54 = vsub.f32 %v651_v12, %v3968_v63  ;;  %v3993_v3 = vsub.f32 %v650_v36, %v3982_v47 }
  0x58   : > { %936 = vmatpush.msra.mxu0 %v757_v17  ;;  %v654_v17 = vld [vmem:[%s5439_s3 + $0xa0] sm:$0xff]  ;;  %1028 = vmatpush.msra.mxu2 %v3916_v9 }
  0x59   : > { %995 = vmatpush.msra.mxu1 %v3637_v18  ;;  %v1094_v18 = vand.u32 4294901760, %v1093_v4  ;;  %v3927_v29 = vand.u32 4294901760, %v654_v17 }
  0x5a   : > { %940 = vmatpush.msra.mxu0 %v763_v21  ;;  %v1104_v21 = vand.u32 4294901760, %v3919_v10 }
  0x5b   : > { %997 = vmatpush.msra.mxu1 %v3652_v30  ;;  %v3930_v30 = vsub.f32 %v655_v2, %v3916_v9  ;;  %1095 = vmatpush.msra.mxu3 %v1094_v18  ;;  %v5450_v2 = vand.u32 4294901760, %v3985_v54  ;;  %v5449_v18 = vand.u32 4294901760, %v3993_v3 }
  0x5c   : > { %944 = vmatpush.msra.mxu0 %v769_v34  ;;  %v1099_v34 = vsub.f32 %v3907_v62, %v1098_v11  ;;  %1030 = vmatpush.msra.mxu2 %v3927_v29 }
  0x5d   : > { %999 = vmatpush.msra.mxu1 %v3667_v20  ;;  %v1105_v20 = vsub.f32 %v3919_v10, %v1104_v21  ;;  %v1141_v44 = vsub.f32 %v3993_v3, %v5449_v18 }
  0x5e   : > { %948 = vmatpush.msra.mxu0 %v775_v46  ;;  %v5454_v46 = vand.u32 4294901760, %v3930_v30  ;;  %1032 = vmatpush.msra.mxu2 %v3943_v50 }
  0x5f   : > { %1001 = vmatpush.msra.mxu1 %v3679_v51  ;;  %v3946_v51 = vsub.f32 %v654_v17, %v3927_v29  ;;  %v1106_v5 = vand.u32 4294901760, %v1105_v20  ;;  %v1135_v17 = vsub.f32 %v3985_v54, %v5450_v2  ;;  %v1142_v20 = vand.u32 4294901760, %v1141_v44 }
  0x60   : > { %952 = vmatpush.msra.mxu0 %v781_v58  ;;  %v1100_v58 = vand.u32 4294901760, %v1099_v34  ;;  %v1111_v33 = vsub.f32 %v3930_v30, %v5454_v46  ;;  %1034 = vmatpush.msra.mxu2 %v3956_v8 }
  0x61   : > { %v5453_v23 = vand.u32 4294901760, %v3946_v51  ;;  %v1136_v34 = vand.u32 4294901760, %v1135_v17 }
  0x62   : > { %956 = vmatpush.msra.mxu0 %v5513_v24  ;;  %1101 = vmatpush.msra.mxu3 %v1100_v58  ;;  %v1112_v41 = vand.u32 4294901760, %v1111_v33  ;;  %v3971_v24 = vsub.f32 %v652_v59, %v3956_v8  ;;  %v323_v58 = vld [vmem:[%s5438_s2] sm:$0x3] }
  0x63   : > { %v1117_v14 = vsub.f32 %v3946_v51, %v5453_v23  ;;  %1036 = vmatpush.msra.mxu2 %v3968_v63 }
  0x64   : > { %960 = vmatpush.msra.mxu0 %v5514_v25  ;;  %1107 = vmatpush.msra.mxu3 %v1106_v5  ;;  %v5452_v25 = vand.u32 4294901760, %v3959_v22  ;;  %v5451_v31 = vand.u32 4294901760, %v3971_v24  ;;  %v325_v5 = vperm.slane %v323_v58, 0 }
  0x65   : > { %1038 = vmatpush.msra.mxu2 %v3982_v47 }
  0x66   : > { %964 = vmatpush.msra.mxu0 %v5515_v27  ;;  %v1118_v27 = vand.u32 4294901760, %v1117_v14  ;;  %1113 = vmatpush.msra.mxu3 %v1112_v41  ;;  %v1123_v43 = vsub.f32 %v3959_v22, %v5452_v25  ;;  %v1129_v55 = vsub.f32 %v3971_v24, %v5451_v31 }
  0x68   : > { %1119 = vmatpush.msra.mxu3 %v1118_v27  ;;  %v1124_v57 = vand.u32 4294901760, %v1123_v43  ;;  %v1130_v4 = vand.u32 4294901760, %v1129_v55  ;;  %v326_v43 = vperm.slane %v323_v58, 1 }
  0x6a   : > { %1125 = vmatpush.msra.mxu3 %v1124_v57 }
  0x6c   : > { %1131 = vmatpush.msra.mxu3 %v1130_v4 }
  0x6e   : > { %1137 = vmatpush.msra.mxu3 %v1136_v34 }
  0x70   : > { %1143 = vmatpush.msra.mxu3 %v1142_v20 }
  0x95   : > { %v389_v59 = vpop.f32.mrf.mxu1 }
  0x98   : > { %v363_v33 = vpop.f32.mrf.mxu0  ;;  %v413_v12 = vpop.f32.mrf.mxu2 }
  0x99   : > { %v364_v41 = vadd.f32 %v363_v33, %v325_v5 }
  0x9b   : > { %v437_v14 = vpop.f32.mrf.mxu3  ;;  %v390_v27 = vadd.f32 %v389_v59, %v364_v41 }
  0x9d   : > { %v414_v36 = vadd.f32 %v413_v12, %v390_v27  ;;  %v483_v55 = vpop.f32.mrf.mxu1  ;;  %v5523_v27 = vand.u32 4294901760, %v3946_v51 }
  0x9f   : > { %v438_v57 = vadd.f32 %v437_v14, %v414_v36 }
  0xa0   : > { %v509_v17 = vpop.f32.mrf.mxu2 }
  0xa1   : > { %v461_v4 = vpop.f32.mrf.mxu0  ;;  %v510_v44 = vadd.f32 %v509_v17, %v326_v43  ;;  %v3336_v17 = vld [vmem:[%s5439_s3 + $0x138] sm:$0xff] }
  0xa2   : > { %v462_v34 = vadd.f32 %v461_v4, %v438_v57 }
  0xa3   : > { %v535_v20 = vpop.f32.mrf.mxu3 }
  0xa4   : > { %v484_v18 = vadd.f32 %v483_v55, %v462_v34  ;;  %v536_v31 = vadd.f32 %v535_v20, %v510_v44  ;;  %v5524_v55 = vand.u32 4294901760, %v3959_v22 }
  0xa5   : > { %v583_v46 = vpop.f32.mrf.mxu1 }
  0xa6   : > { %v632_v2 = vmax.f32 %v484_v18, 0.0 }
  0xa8   : > { %v4005_v25 = vand.u32 4294901760, %v632_v2 }
  0xa9   : > { %v559_v23 = vpop.f32.mrf.mxu0  ;;  %v607_v58 = vpop.f32.mrf.mxu2 }
  0xaa   : > { %v4008_v5 = vsub.f32 %v632_v2, %v4005_v25  ;;  %v560_v59 = vadd.f32 %v559_v23, %v536_v31  ;;  %804 = vmatmul.f32.vlgmr.msrb.gmra.mxu1 %v4005_v25 }
  0xab   : > { %1204 = vmatpush.msrb.mxu1 %v3714_v16  ;;  %v629_v18 = vpop.f32.mrf.mxu3 }
  0xac   : > { %5516 = vst [vmem:[#allocation2_spill] sm:$0xff] %v4008_v5  ;;  %v584_v33 = vadd.f32 %v583_v46, %v560_v59  ;;  %858 = vmatmul.f32.vlgmr.msrb.gmra.mxu2 %v4008_v5  ;;  %v4014_v12 = vand.u32 4294901760, %v4008_v5  ;;  %v5518_v46 = vand.u32 4294901760, %v3752_v26 }
  0xad   : > { %1206 = vmatpush.msrb.mxu1 %v3726_v40  ;;  %1245 = vmatpush.msrb.mxu2 %v1050_v15 }
  0xae   : > { %5517 = vst [vmem:[#allocation3_spill] sm:$0xff] %v4014_v12  ;;  %v608_v2 = vadd.f32 %v607_v58, %v584_v33  ;;  %897 = vmatmul.f32.vlgmr.msrb.gmra.mxu3 %v4014_v12  ;;  %v701_v23 = vsub.f32 %v4008_v5, %v4014_v12  ;;  %v4187_v58 = vand.u32 4294901760, %v3336_v17 }
  0xaf   : > { %1208 = vmatpush.msrb.mxu1 %v3740_v56  ;;  %1249 = vmatpush.msrb.mxu2 %v5518_v46 }
  0xb0   : > { %1312 = vmatpush.msrb.mxu3 %v3714_v16  ;;  %v630_v31 = vadd.f32 %v629_v18, %v608_v2  ;;  %v4026_v41 = vand.u32 4294901760, %v701_v23 }
  0xb1   : > { %1210 = vmatpush.msrb.mxu1 %v3754_v13  ;;  %1253 = vmatpush.msrb.mxu2 %v1062_v45  ;;  %v3341_v45 = vld [vmem:[%s5439_s3 + $0x160] sm:$0xff] }
  0xb2   : > { %5519 = vst [vmem:[#allocation4_spill] sm:$0xff] %v4026_v41  ;;  %v633_v15 = vmax.f32 %v630_v31, 0.0  ;;  %1314 = vmatpush.msrb.mxu3 %v3726_v40  ;;  %703 = vmatmul.f32.vlgmr.msrb.gmra.mxu0 %v4026_v41  ;;  %v3344_v40 = vld [vmem:[%s5439_s3 + $0x178] sm:$0xff] }
  0xb3   : > { %1003 = vmatmul.f32.vlgmr.msra.gmra.mxu1 %v4005_v25  ;;  %1151 = vmatpush.msrb.mxu0 %v3738_v52 }
  0xb4   : > { %v4035_v14 = vand.u32 4294901760, %v633_v15  ;;  %1212 = vmatpush.msrb.mxu1 %v3763_v1  ;;  %1257 = vmatpush.msrb.mxu2 %v1068_v7 }
  0xb5   : > { %1316 = vmatpush.msrb.mxu3 %v3740_v56  ;;  %1154 = vmatpush.msrb.mxu0 %v3752_v26  ;;  %v3343_v56 = vld [vmem:[%s5439_s3 + $0x170] sm:$0xff] }
  0xb6   : > { %v4043_v16 = vsub.f32 %v633_v15, %v4035_v14  ;;  %1214 = vmatpush.msrb.mxu1 %v3824_v19  ;;  %1261 = vmatpush.msrb.mxu2 %v1074_v6  ;;  %v3340_v6 = vld [vmem:[%s5439_s3 + $0x158] sm:$0xff] }
  0xb7   : > { %1318 = vmatpush.msrb.mxu3 %v3754_v13  ;;  %1157 = vmatpush.msrb.mxu0 %v3761_v28  ;;  %v4069_v13 = vand.u32 4294901760, %v3344_v40  ;;  %v4080_v28 = vand.u32 4294901760, %v3343_v56 }
  0xb8   : > { %5520 = vst [vmem:[#allocation5_spill] sm:$0xff] %v4043_v16  ;;  %v4054_v52 = vand.u32 4294901760, %v4043_v16  ;;  %1216 = vmatpush.msrb.mxu1 %v3868_v32  ;;  %1265 = vmatpush.msrb.mxu2 %v1080_v37 }
  0xb9   : > { %1320 = vmatpush.msrb.mxu3 %v3763_v1  ;;  %1160 = vmatpush.msrb.mxu0 %v3770_v38  ;;  %v3342_v1 = vld [vmem:[%s5439_s3 + $0x168] sm:$0xff] }
  0xba   : > { %5521 = vst [vmem:[#allocation6_spill] sm:$0xff] %v4054_v52  ;;  %1218 = vmatpush.msrb.mxu1 %v3878_v39  ;;  %1269 = vmatpush.msrb.mxu2 %v1086_v48  ;;  %v1042_v26 = vsub.f32 %v4043_v16, %v4054_v52  ;;  %v4093_v7 = vand.u32 4294901760, %v3342_v1  ;;  %v3338_v48 = vld [vmem:[%s5439_s3 + $0x148] sm:$0xff] }
  0xbb   : > { %1322 = vmatpush.msrb.mxu3 %v3824_v19  ;;  %966 = vmatmul.f32.vlgmr.msra.gmra.mxu0 %v4005_v25  ;;  %v4104_v19 = vsub.f32 %v3343_v56, %v4080_v28  ;;  %v4151_v43 = vand.u32 4294901760, %v3338_v48  ;;  %v3333_v56 = vld [vmem:[%s5439_s3 + $0x120] sm:$0xff] }
  0xbc   : > { %1163 = vmatpush.msrb.mxu0 %v3780_v0  ;;  %1220 = vmatpush.msrb.mxu1 %v3891_v49  ;;  %v4078_v38 = vand.u32 4294901760, %v1042_v26  ;;  %v4091_v0 = vsub.f32 %v3344_v40, %v4069_v13  ;;  %v4115_v37 = vsub.f32 %v3342_v1, %v4093_v7 }
  0xbd   : > { %1273 = vmatpush.msrb.mxu2 %v1092_v60  ;;  %1324 = vmatpush.msrb.mxu3 %v3868_v32  ;;  %v4106_v32 = vand.u32 4294901760, %v3341_v45  ;;  %v4180_v59 = vsub.f32 %v3338_v48, %v4151_v43  ;;  %v4235_v48 = vand.u32 4294901760, %v3333_v56 }
  0xbe   : > { %1166 = vmatpush.msrb.mxu0 %v3871_v35  ;;  %1222 = vmatpush.msrb.mxu1 %v3904_v61  ;;  %v5472_v35 = vand.u32 4294901760, %v4091_v0  ;;  %v5469_v36 = vand.u32 4294901760, %v4115_v37 }
  0xbf   : > { %1277 = vmatpush.msrb.mxu2 %v1098_v11  ;;  %1326 = vmatpush.msrb.mxu3 %v3878_v39  ;;  %v4117_v39 = vand.u32 4294901760, %v3340_v6  ;;  %v4132_v60 = vsub.f32 %v3341_v45, %v4106_v32  ;;  %v5464_v40 = vand.u32 4294901760, %v4180_v59 }
  0xc0   : > { %1044 = vmatmul.f32.vlgmr.msra.gmra.mxu2 %v4078_v38  ;;  %1169 = vmatpush.msrb.mxu0 %v3881_v42  ;;  %v3339_v42 = vld [vmem:[%s5439_s3 + $0x150] sm:$0xff]  ;;  %v1437_v44 = vsub.f32 %v4115_v37, %v5469_v36 }
  0xc1   : > { %1224 = vmatpush.msrb.mxu1 %v3916_v9  ;;  %1281 = vmatpush.msrb.mxu2 %v1104_v21  ;;  %v4136_v11 = vand.u32 4294901760, %v3339_v42  ;;  %v3337_v21 = vld [vmem:[%s5439_s3 + $0x140] sm:$0xff]  ;;  %v5468_v57 = vand.u32 4294901760, %v4132_v60 }
  0xc2   : > { %1328 = vmatpush.msrb.mxu3 %v3891_v49  ;;  %1172 = vmatpush.msrb.mxu0 %v3894_v53  ;;  %v5522_v49 = vand.u32 4294901760, %v3930_v30  ;;  %v5470_v53 = vand.u32 4294901760, %v4104_v19  ;;  %v4162_v4 = vand.u32 4294901760, %v3337_v21  ;;  %v1438_v31 = vand.u32 4294901760, %v1437_v44 }
  0xc3   : > { %1145 = vmatmul.f32.vlgmr.msra.gmra.mxu3 %v4035_v14  ;;  %1226 = vmatpush.msrb.mxu1 %v3927_v29  ;;  %v1443_v18 = vsub.f32 %v4132_v60, %v5468_v57  ;;  %v3352_v57 = vld [vmem:[%s5439_s3 + $0x1b8] sm:$0xff] }
  0xc4   : > { %1285 = vmatpush.msrb.mxu2 %v5522_v49  ;;  %1330 = vmatpush.msrb.mxu3 %v3904_v61  ;;  %v1425_v61 = vsub.f32 %v4091_v0, %v5472_v35  ;;  %v4196_v2 = vsub.f32 %v3337_v21, %v4162_v4  ;;  %v1461_v21 = vsub.f32 %v4180_v59, %v5464_v40  ;;  %v3351_v35 = vld [vmem:[%s5439_s3 + $0x1b0] sm:$0xff] }
  0xc5   : > { %1175 = vmatpush.msrb.mxu0 %v3907_v62  ;;  %1228 = vmatpush.msrb.mxu1 %v3943_v50  ;;  %v4149_v62 = vsub.f32 %v3340_v6, %v4117_v39  ;;  %v1444_v1 = vand.u32 4294901760, %v1443_v18  ;;  %v3332_v6 = vld [vmem:[%s5439_s3 + $0x118] sm:$0xff] }
  0xc6   : > { %1289 = vmatpush.msrb.mxu2 %v5523_v27  ;;  %1332 = vmatpush.msrb.mxu3 %v3916_v9  ;;  %v1431_v9 = vsub.f32 %v4104_v19, %v5470_v53  ;;  %v1426_v34 = vand.u32 4294901760, %v1425_v61  ;;  %v5463_v45 = vand.u32 4294901760, %v4196_v2  ;;  %v4250_v61 = vand.u32 4294901760, %v3332_v6 }
  0xc7   : > { %1178 = vmatpush.msrb.mxu0 %v3919_v10  ;;  %1230 = vmatpush.msrb.mxu1 %v3956_v8  ;;  %v4170_v10 = vsub.f32 %v3339_v42, %v4136_v11  ;;  %v5466_v20 = vand.u32 4294901760, %v4149_v62  ;;  %v1462_v44 = vand.u32 4294901760, %v1461_v21 }
  0xc8   : > { %1293 = vmatpush.msrb.mxu2 %v5524_v55  ;;  %1334 = vmatpush.msrb.mxu3 %v3927_v29  ;;  %v5525_v29 = vand.u32 4294901760, %v3971_v24  ;;  %v1432_v33 = vand.u32 4294901760, %v1431_v9  ;;  %v1467_v55 = vsub.f32 %v4196_v2, %v5463_v45  ;;  %v3330_v9 = vld [vmem:[%s5439_s3 + $0x108] sm:$0xff]  ;;  %v4278_v18 = vsub.f32 %v3332_v6, %v4250_v61 }
  0xc9   : > { %1181 = vmatpush.msrb.mxu0 %v3930_v30  ;;  %1232 = vmatpush.msrb.mxu1 %v3968_v63  ;;  %v3335_v30 = vld [vmem:[%s5439_s3 + $0x130] sm:$0xff]  ;;  %v5465_v23 = vand.u32 4294901760, %v4170_v10  ;;  %v1449_v15 = vsub.f32 %v4149_v62, %v5466_v20  ;;  %v3353_v20 = vld [vmem:[%s5439_s3 + $0x1c0] sm:$0xff] }
  0xca   : > { %1297 = vmatpush.msrb.mxu2 %v5525_v29  ;;  %1336 = vmatpush.msrb.mxu3 %v3943_v50  ;;  %v5526_v50 = vand.u32 4294901760, %v3985_v54  ;;  %v4204_v46 = vand.u32 4294901760, %v3335_v30  ;;  %v4427_v53 = vand.u32 4294901760, %v3353_v20 }
  0xcb   : > { %1184 = vmatpush.msrb.mxu0 %v3946_v51  ;;  %1234 = vmatpush.msrb.mxu1 %v3982_v47  ;;  %v3334_v51 = vld [vmem:[%s5439_s3 + $0x128] sm:$0xff]  ;;  %v1450_v49 = vand.u32 4294901760, %v1449_v15 }
  0xcc   : > { %1301 = vmatpush.msrb.mxu2 %v5526_v50  ;;  %1338 = vmatpush.msrb.mxu3 %v3956_v8  ;;  %v5527_v8 = vand.u32 4294901760, %v3993_v3  ;;  %v4220_v26 = vand.u32 4294901760, %v3334_v51  ;;  %v4233_v42 = vsub.f32 %v3335_v30, %v4204_v46  ;;  %v3329_v30 = vld [vmem:[%s5439_s3 + $0x100] sm:$0xff] }
  0xcd   : > { %1238 = vmatmul.f32.vlgmr.msrb.gmra.mxu1 %v4054_v52  ;;  %1187 = vmatpush.msrb.mxu0 %v3959_v22  ;;  %v4218_v22 = vsub.f32 %v3336_v17, %v4187_v58  ;;  %v4459_v52 = vand.u32 4294901760, %v3351_v35 }
  0xce   : > { %1427 = vmatpush.msra.mxu1 %v1426_v34  ;;  %1305 = vmatpush.msrb.mxu2 %v5527_v8  ;;  %v4248_v27 = vsub.f32 %v3334_v51, %v4220_v26  ;;  %v5460_v29 = vand.u32 4294901760, %v4233_v42  ;;  %v4263_v34 = vsub.f32 %v3333_v56, %v4235_v48  ;;  %v1468_v51 = vand.u32 4294901760, %v1467_v55 }
  0xcf   : > { %1340 = vmatpush.msrb.mxu3 %v3968_v63  ;;  %1307 = vmatmul.f32.vlgmr.msrb.gmra.mxu2 %v4035_v14  ;;  %v1455_v63 = vsub.f32 %v4170_v10, %v5465_v23  ;;  %v4292_v56 = vand.u32 4294901760, %v3329_v30 }
  0xd0   : > { %1433 = vmatpush.msra.mxu1 %v1432_v33  ;;  %1525 = vmatpush.msra.mxu2 %v4091_v0  ;;  %v5459_v33 = vand.u32 4294901760, %v4248_v27  ;;  %v1479_v8 = vsub.f32 %v4233_v42, %v5460_v29 }
  0xd1   : > { %1190 = vmatpush.msrb.mxu0 %v3971_v24  ;;  %1342 = vmatpush.msrb.mxu3 %v3982_v47  ;;  %v3331_v24 = vld [vmem:[%s5439_s3 + $0x110] sm:$0xff]  ;;  %v5462_v47 = vand.u32 4294901760, %v4218_v22  ;;  %v1456_v17 = vand.u32 4294901760, %v1455_v63  ;;  %v5455_v63 = vand.u32 4294901760, %v4278_v18 }
  0xd2   : > { %1344 = vmatmul.f32.vlgmr.msrb.gmra.mxu3 %v4035_v14  ;;  %1439 = vmatpush.msra.mxu1 %v1438_v31  ;;  %v5456_v31 = vand.u32 4294901760, %v4263_v34  ;;  %v1485_v6 = vsub.f32 %v4248_v27, %v5459_v33  ;;  %v1480_v21 = vand.u32 4294901760, %v1479_v8  ;;  %v3357_v33 = vld [vmem:[%s5439_s3 + $0x1e0] sm:$0xff] }
  0xd3   : > { %1528 = vmatpush.msra.mxu2 %v4104_v19  ;;  %1578 = vmatpush.msra.mxu3 %v4069_v13  ;;  %v1473_v50 = vsub.f32 %v4218_v22, %v5462_v47  ;;  %v3355_v47 = vld [vmem:[%s5439_s3 + $0x1d0] sm:$0xff] }
  0xd4   : > { %1193 = vmatpush.msrb.mxu0 %v3985_v54  ;;  %1445 = vmatpush.msra.mxu1 %v1444_v1  ;;  %v4265_v54 = vand.u32 4294901760, %v3331_v24 }
  0xd5   : > { %1531 = vmatpush.msra.mxu2 %v4115_v37  ;;  %1580 = vmatpush.msra.mxu3 %v4080_v28  ;;  %v1474_v1 = vand.u32 4294901760, %v1473_v50  ;;  %v1497_v50 = vsub.f32 %v4278_v18, %v5455_v63 }
  0xd6   : > { %1196 = vmatpush.msrb.mxu0 %v3993_v3  ;;  %1451 = vmatpush.msra.mxu1 %v1450_v49  ;;  %v4280_v3 = vand.u32 4294901760, %v3330_v9  ;;  %v4290_v15 = vsub.f32 %v3331_v24, %v4265_v54  ;;  %v1491_v24 = vsub.f32 %v4263_v34, %v5456_v31 }
  0xd7   : > { %1199 = vmatmul.f32.vlgmr.msrb.gmra.mxu0 %v4043_v16  ;;  %1534 = vmatpush.msra.mxu2 %v4132_v60  ;;  %v1498_v31 = vand.u32 4294901760, %v1497_v50  ;;  %v4443_v16 = vand.u32 4294901760, %v3352_v57 }
  0xd8   : > { %1382 = vmatpush.msra.mxu0 %v4069_v13  ;;  %1582 = vmatpush.msra.mxu3 %v4093_v7  ;;  %v4302_v49 = vsub.f32 %v3330_v9, %v4280_v3  ;;  %v5457_v55 = vand.u32 4294901760, %v4290_v15  ;;  %v3360_v9 = vld [vmem:[%s5439_s3 + $0x1f8] sm:$0xff]  ;;  %v1492_v8 = vand.u32 4294901760, %v1491_v24 }
  0xd9   : > { %1457 = vmatpush.msra.mxu1 %v1456_v17  ;;  %1537 = vmatpush.msra.mxu2 %v4149_v62  ;;  %v4312_v17 = vsub.f32 %v3329_v30, %v4292_v56  ;;  %v3359_v30 = vld [vmem:[%s5439_s3 + $0x1f0] sm:$0xff]  ;;  %v4334_v63 = vand.u32 4294901760, %v3360_v9 }
  0xda   : > { %1384 = vmatpush.msra.mxu0 %v4080_v28  ;;  %1584 = vmatpush.msra.mxu3 %v4106_v32  ;;  %v4342_v24 = vand.u32 4294901760, %v3359_v30 }
  0xdb   : > { %1463 = vmatpush.msra.mxu1 %v1462_v44  ;;  %1540 = vmatpush.msra.mxu2 %v4170_v10  ;;  %v1486_v44 = vand.u32 4294901760, %v1485_v6  ;;  %v5461_v6 = vand.u32 4294901760, %v4312_v17 }
  0xdc   : > { %1386 = vmatpush.msra.mxu0 %v4093_v7  ;;  %1586 = vmatpush.msra.mxu3 %v4117_v39 }
  0xdd   : > { %1469 = vmatpush.msra.mxu1 %v1468_v51  ;;  %1543 = vmatpush.msra.mxu2 %v4180_v59  ;;  %v5458_v51 = vand.u32 4294901760, %v4302_v49  ;;  %v1515_v50 = vsub.f32 %v4312_v17, %v5461_v6  ;;  %v4372_v6 = vand.u32 4294901760, %v3357_v33 }
  0xde   : > { %1388 = vmatpush.msra.mxu0 %v4106_v32  ;;  %1588 = vmatpush.msra.mxu3 %v4136_v11 }
  0xdf   : > { %1475 = vmatpush.msra.mxu1 %v1474_v1  ;;  %1546 = vmatpush.msra.mxu2 %v4196_v2  ;;  %v1503_v1 = vsub.f32 %v4290_v15, %v5457_v55  ;;  %v3358_v55 = vld [vmem:[%s5439_s3 + $0x1e8] sm:$0xff]  ;;  %v4396_v23 = vsub.f32 %v3357_v33, %v4372_v6 }
  0xe0   : > { %1390 = vmatpush.msra.mxu0 %v4117_v39  ;;  %1590 = vmatpush.msra.mxu3 %v4151_v43  ;;  %v4361_v29 = vand.u32 4294901760, %v3358_v55 }
  0xe1   : > { %1481 = vmatpush.msra.mxu1 %v1480_v21  ;;  %1549 = vmatpush.msra.mxu2 %v4218_v22  ;;  %v1509_v21 = vsub.f32 %v4302_v49, %v5458_v51  ;;  %v4354_v51 = vsub.f32 %v3360_v9, %v4334_v63  ;;  %v4368_v9 = vsub.f32 %v3359_v30, %v4342_v24 }
  0xe2   : > { %1392 = vmatpush.msra.mxu0 %v4136_v11  ;;  %1592 = vmatpush.msra.mxu3 %v4162_v4  ;;  %v4384_v30 = vsub.f32 %v3358_v55, %v4361_v29  ;;  %5528 = vst [vmem:[#allocation7_spill] sm:$0xff] %v4396_v23 }
  0xe3   : > { %1487 = vmatpush.msra.mxu1 %v1486_v44  ;;  %1552 = vmatpush.msra.mxu2 %v4233_v42  ;;  %v1504_v44 = vand.u32 4294901760, %v1503_v1  ;;  %v1510_v1 = vand.u32 4294901760, %v1509_v21  ;;  %v5467_v45 = vand.u32 4294901760, %v4354_v51  ;;  %v5471_v40 = vand.u32 4294901760, %v4368_v9 }
  0xe4   : > { %1394 = vmatpush.msra.mxu0 %v4151_v43  ;;  %1594 = vmatpush.msra.mxu3 %v4187_v58  ;;  %v5475_v33 = vand.u32 4294901760, %v4384_v30 }
  0xe5   : > { %1493 = vmatpush.msra.mxu1 %v1492_v8  ;;  %1555 = vmatpush.msra.mxu2 %v4248_v27  ;;  %v3356_v8 = vld [vmem:[%s5439_s3 + $0x1d8] sm:$0xff]  ;;  %v1766_v55 = vsub.f32 %v4354_v51, %v5467_v45 }
  0xe6   : > { %1396 = vmatpush.msra.mxu0 %v4162_v4  ;;  %1596 = vmatpush.msra.mxu3 %v4204_v46  ;;  %v4379_v21 = vand.u32 4294901760, %v3356_v8 }
  0xe7   : > { %1499 = vmatpush.msra.mxu1 %v1498_v31  ;;  %1558 = vmatpush.msra.mxu2 %v4263_v34  ;;  %v1516_v31 = vand.u32 4294901760, %v1515_v50  ;;  %v3354_v50 = vld [vmem:[%s5439_s3 + $0x1c8] sm:$0xff] }
  0xe8   : > { %1398 = vmatpush.msra.mxu0 %v4187_v58  ;;  %1598 = vmatpush.msra.mxu3 %v4220_v26 }
  0xe9   : > { %1505 = vmatpush.msra.mxu1 %v1504_v44  ;;  %1561 = vmatpush.msra.mxu2 %v4278_v18  ;;  %v4388_v44 = vand.u32 4294901760, %v3355_v47 }
  0xea   : > { %1400 = vmatpush.msra.mxu0 %v4204_v46  ;;  %1600 = vmatpush.msra.mxu3 %v4235_v48 }
  0xeb   : > { %1511 = vmatpush.msra.mxu1 %v1510_v1  ;;  %1564 = vmatpush.msra.mxu2 %v4290_v15  ;;  %v4403_v1 = vsub.f32 %v3356_v8, %v4379_v21  ;;  %v1772_v8 = vsub.f32 %v4368_v9, %v5471_v40  ;;  %v4419_v45 = vsub.f32 %v3355_v47, %v4388_v44  ;;  %v1767_v40 = vand.u32 4294901760, %v1766_v55 }
  0xec   : > { %1402 = vmatpush.msra.mxu0 %v4220_v26  ;;  %1602 = vmatpush.msra.mxu3 %v4250_v61 }
  0xed   : > { %1517 = vmatpush.msra.mxu1 %v1516_v31  ;;  %1567 = vmatpush.msra.mxu2 %v4302_v49  ;;  %5529 = vst [vmem:[#allocation8_spill] sm:$0xff] %v4403_v1  ;;  %v4411_v31 = vand.u32 4294901760, %v3354_v50  ;;  %v1773_v55 = vand.u32 4294901760, %v1772_v8  ;;  %v5532_v8 = vand.u32 4294901760, %v4403_v1 }
  0xee   : > { %1404 = vmatpush.msra.mxu0 %v4235_v48  ;;  %1604 = vmatpush.msra.mxu3 %v4265_v54  ;;  %5530 = vst [vmem:[#allocation9_spill] sm:$0xff] %v4419_v45 }
  0xef   : > { %1519 = vmatmul.f32.vlgmr.msra.gmra.mxu1 %v4005_v25  ;;  %1570 = vmatpush.msra.mxu2 %v4312_v17  ;;  %v4441_v36 = vsub.f32 %v3354_v50, %v4411_v31  ;;  %v5531_v50 = vand.u32 4294901760, %v4396_v23  ;;  %v1790_v47 = vsub.f32 %v4403_v1, %v5532_v8  ;;  %v3348_v1 = vld [vmem:[%s5439_s3 + $0x198] sm:$0xff] }
  0xf0   : > { %1686 = vmatpush.msrb.mxu1 %v4069_v13  ;;  %1406 = vmatpush.msra.mxu0 %v4250_v61  ;;  %v1778_v13 = vsub.f32 %v4384_v30, %v5475_v33 }
  0xf1   : > { %1606 = vmatpush.msra.mxu3 %v4280_v3  ;;  %1573 = vmatmul.f32.vlgmr.msra.gmra.mxu2 %v4008_v5  ;;  %v1784_v33 = vsub.f32 %v4396_v23, %v5531_v50  ;;  %v4457_v5 = vsub.f32 %v3353_v20, %v4427_v53 }
  0xf2   : > { %1688 = vmatpush.msrb.mxu1 %v4080_v28  ;;  %1723 = vmatpush.msrb.mxu2 %v4334_v63  ;;  %v3350_v28 = vld [vmem:[%s5439_s3 + $0x1a8] sm:$0xff]  ;;  %v1779_v50 = vand.u32 4294901760, %v1778_v13  ;;  %v4487_v13 = vsub.f32 %v3351_v35, %v4459_v52 }
  0xf3   : > { %1408 = vmatpush.msra.mxu0 %v4265_v54  ;;  %1608 = vmatpush.msra.mxu3 %v4292_v56  ;;  %v4474_v23 = vand.u32 4294901760, %v3350_v28 }
  0xf4   : > { %1612 = vmatmul.f32.vlgmr.msra.gmra.mxu3 %v4014_v12  ;;  %1690 = vmatpush.msrb.mxu1 %v4093_v7  ;;  %v3349_v7 = vld [vmem:[%s5439_s3 + $0x1a0] sm:$0xff]  ;;  %v4472_v12 = vsub.f32 %v3352_v57, %v4443_v16 }
  0xf5   : > { %1725 = vmatpush.msrb.mxu2 %v4342_v24  ;;  %1768 = vmatpush.msrb.mxu3 %v1767_v40  ;;  %v5533_v40 = vand.u32 4294901760, %v4419_v45  ;;  %v4489_v20 = vand.u32 4294901760, %v3349_v7  ;;  %v4503_v57 = vsub.f32 %v3350_v28, %v4474_v23 }
  0xf6   : > { %1410 = vmatpush.msra.mxu0 %v4280_v3  ;;  %1692 = vmatpush.msrb.mxu1 %v4106_v32  ;;  %v1785_v32 = vand.u32 4294901760, %v1784_v33 }
  0xf7   : > { %1727 = vmatpush.msrb.mxu2 %v4361_v29  ;;  %1774 = vmatpush.msrb.mxu3 %v1773_v55  ;;  %v1796_v8 = vsub.f32 %v4419_v45, %v5533_v40  ;;  %v1791_v55 = vand.u32 4294901760, %v1790_v47  ;;  %v3347_v40 = vld [vmem:[%s5439_s3 + $0x190] sm:$0xff]  ;;  %v5534_v45 = vand.u32 4294901760, %v4091_v0  ;;  %v5536_v0 = vand.u32 4294901760, %v4104_v19 }
  0xf8   : > { %1412 = vmatpush.msra.mxu0 %v4292_v56  ;;  %1694 = vmatpush.msrb.mxu1 %v4117_v39  ;;  %v5535_v39 = vand.u32 4294901760, %v4441_v36  ;;  %v4516_v28 = vsub.f32 %v3349_v7, %v4489_v20  ;;  %v4518_v33 = vand.u32 4294901760, %v3347_v40  ;;  %v5538_v19 = vand.u32 4294901760, %v4115_v37 }
  0xf9   : > { %1418 = vmatmul.f32.vlgmr.msra.gmra.mxu0 %v4026_v41  ;;  %1729 = vmatpush.msrb.mxu2 %v4372_v6  ;;  %v4505_v41 = vand.u32 4294901760, %v3348_v1  ;;  %v1797_v47 = vand.u32 4294901760, %v1796_v8 }
  0xfa   : > { %1619 = vmatpush.msrb.mxu0 %v5534_v45  ;;  %1780 = vmatpush.msrb.mxu3 %v1779_v50  ;;  %v1802_v35 = vsub.f32 %v4441_v36, %v5535_v39  ;;  %v5537_v45 = vand.u32 4294901760, %v4457_v5  ;;  %v1819_v39 = vand.u32 4294901760, %v4487_v13 }
  0xfb   : > { %1696 = vmatpush.msrb.mxu1 %v4136_v11  ;;  %1731 = vmatpush.msrb.mxu2 %v4379_v21  ;;  %v3346_v11 = vld [vmem:[%s5439_s3 + $0x188] sm:$0xff] }
  0xfc   : > { %1623 = vmatpush.msrb.mxu0 %v5536_v0  ;;  %1786 = vmatpush.msrb.mxu3 %v1785_v32  ;;  %v1808_v50 = vsub.f32 %v4457_v5, %v5537_v45  ;;  %v1803_v8 = vand.u32 4294901760, %v1802_v35  ;;  %v5539_v32 = vand.u32 4294901760, %v4472_v12  ;;  %v1825_v0 = vand.u32 4294901760, %v4503_v57 }
  0xfd   : > { %1698 = vmatpush.msrb.mxu1 %v4151_v43  ;;  %1733 = vmatpush.msrb.mxu2 %v4388_v44  ;;  %v4532_v45 = vsub.f32 %v3348_v1, %v4505_v41  ;;  %v3345_v43 = vld [vmem:[%s5439_s3 + $0x180] sm:$0xff]  ;;  %v4539_v37 = vand.u32 4294901760, %v3346_v11  ;;  %v1820_v1 = vsub.f32 %v4487_v13, %v1819_v39 }
  0xfe   : > { %1627 = vmatpush.msrb.mxu0 %v5538_v19  ;;  %1792 = vmatpush.msrb.mxu3 %v1791_v55  ;;  %v1814_v7 = vsub.f32 %v4472_v12, %v5539_v32  ;;  %v5540_v55 = vand.u32 4294901760, %v4132_v60  ;;  %v1809_v35 = vand.u32 4294901760, %v1808_v50  ;;  %v1831_v19 = vand.u32 4294901760, %v4516_v28 }
  0xff   : > { %1700 = vmatpush.msrb.mxu1 %v4162_v4  ;;  %1735 = vmatpush.msrb.mxu2 %v4411_v31  ;;  %v4548_v32 = vsub.f32 %v3347_v40, %v4518_v33  ;;  %v4552_v4 = vand.u32 4294901760, %v3345_v43  ;;  %v5541_v60 = vand.u32 4294901760, %v4149_v62  ;;  %v1826_v50 = vsub.f32 %v4503_v57, %v1825_v0 }
 0x100   : > { %1631 = vmatpush.msrb.mxu0 %v5540_v55  ;;  %1798 = vmatpush.msrb.mxu3 %v1797_v47  ;;  %v1815_v47 = vand.u32 4294901760, %v1814_v7  ;;  %v1837_v55 = vand.u32 4294901760, %v4532_v45  ;;  %v5542_v40 = vand.u32 4294901760, %v4170_v10  ;;  %v1821_v62 = vand.u32 4294901760, %v1820_v1 }
 0x101   : > { %1702 = vmatpush.msrb.mxu1 %v4187_v58  ;;  %1737 = vmatpush.msrb.mxu2 %v4427_v53  ;;  %v4563_v58 = vsub.f32 %v3346_v11, %v4539_v37  ;;  %v1843_v7 = vand.u32 4294901760, %v4548_v32  ;;  %v5543_v11 = vand.u32 4294901760, %v4180_v59  ;;  %v1827_v10 = vand.u32 4294901760, %v1826_v50 }
 0x102   : > { %1635 = vmatpush.msrb.mxu0 %v5541_v60  ;;  %1804 = vmatpush.msrb.mxu3 %v1803_v8  ;;  %v1832_v8 = vsub.f32 %v4516_v28, %v1831_v19  ;;  %v5544_v1 = vand.u32 4294901760, %v4196_v2  ;;  %v5546_v50 = vand.u32 4294901760, %v4233_v42 }
 0x103   : > { %1704 = vmatpush.msrb.mxu1 %v4204_v46  ;;  %1739 = vmatpush.msrb.mxu2 %v4443_v16  ;;  %v4574_v46 = vsub.f32 %v3345_v43, %v4552_v4  ;;  %v1844_v59 = vsub.f32 %v4548_v32, %v1843_v7 }
 0x104   : > { %1639 = vmatpush.msrb.mxu0 %v5542_v40  ;;  %1810 = vmatpush.msrb.mxu3 %v1809_v35  ;;  %v1838_v35 = vsub.f32 %v4532_v45, %v1837_v55  ;;  %v1833_v43 = vand.u32 4294901760, %v1832_v8  ;;  %v5548_v40 = vand.u32 4294901760, %v4263_v34  ;;  %v5551_v34 = vand.u32 4294901760, %v4290_v15 }
 0x105   : > { %1706 = vmatpush.msrb.mxu1 %v4220_v26  ;;  %1741 = vmatpush.msrb.mxu2 %v4459_v52  ;;  %v1849_v26 = vand.u32 4294901760, %v4563_v58  ;;  %v1855_v60 = vand.u32 4294901760, %v4574_v46  ;;  %v5554_v8 = vand.u32 4294901760, %v4384_v30  ;;  %v5555_v15 = vand.u32 4294901760, %v4312_v17  ;;  %v3376_v17 = vld [vmem:[%s5439_s3 + $0x278] sm:$0xff] }
 0x106   : > { %1643 = vmatpush.msrb.mxu0 %v5543_v11  ;;  %1816 = vmatpush.msrb.mxu3 %v1815_v47  ;;  %v1839_v47 = vand.u32 4294901760, %v1838_v35  ;;  %v5556_v11 = vld [vmem:[#allocation7_spill] sm:$0xff] }
 0x107   : > { %1708 = vmatpush.msrb.mxu1 %v4235_v48  ;;  %1743 = vmatpush.msrb.mxu2 %v4474_v23  ;;  %v5545_v48 = vand.u32 4294901760, %v4218_v22  ;;  %v1850_v2 = vsub.f32 %v4563_v58, %v1849_v26  ;;  %v1856_v22 = vsub.f32 %v4574_v46, %v1855_v60 }
 0x108   : > { %1647 = vmatpush.msrb.mxu0 %v5544_v1  ;;  %1822 = vmatpush.msrb.mxu3 %v1821_v62  ;;  %v5552_v62 = vand.u32 4294901760, %v4368_v9 }
 0x109   : > { %1710 = vmatpush.msrb.mxu1 %v4250_v61  ;;  %1745 = vmatpush.msrb.mxu2 %v4489_v20  ;;  %v1845_v61 = vand.u32 4294901760, %v1844_v59  ;;  %v1851_v42 = vand.u32 4294901760, %v1850_v2 }
 0x10a   : > { %1651 = vmatpush.msrb.mxu0 %v5545_v48  ;;  %1828 = vmatpush.msrb.mxu3 %v1827_v10  ;;  %v5557_v10 = vand.u32 4294901760, %v5556_v11  ;;  %v3372_v48 = vld [vmem:[%s5439_s3 + $0x258] sm:$0xff] }
 0x10b   : > { %1712 = vmatpush.msrb.mxu1 %v4265_v54  ;;  %1747 = vmatpush.msrb.mxu2 %v4505_v41  ;;  %v5547_v54 = vand.u32 4294901760, %v4248_v27  ;;  %v5549_v27 = vand.u32 4294901760, %v4278_v18  ;;  %v5553_v18 = vand.u32 4294901760, %v4302_v49 }
 0x10c   : > { %1655 = vmatpush.msrb.mxu0 %v5546_v50  ;;  %1834 = vmatpush.msrb.mxu3 %v1833_v43 }
 0x10d   : > { %1714 = vmatpush.msrb.mxu1 %v4280_v3  ;;  %1749 = vmatpush.msrb.mxu2 %v4518_v33  ;;  %v1857_v3 = vand.u32 4294901760, %v1856_v22 }
 0x10e   : > { %1659 = vmatpush.msrb.mxu0 %v5547_v54  ;;  %1840 = vmatpush.msrb.mxu3 %v1839_v47 }
 0x10f   : > { %1716 = vmatpush.msrb.mxu1 %v4292_v56  ;;  %1751 = vmatpush.msrb.mxu2 %v4539_v37  ;;  %v5550_v56 = vand.u32 4294901760, %v4354_v51 }
 0x110   : > { %1663 = vmatpush.msrb.mxu0 %v5548_v40  ;;  %1846 = vmatpush.msrb.mxu3 %v1845_v61  ;;  %v3371_v61 = vld [vmem:[%s5439_s3 + $0x250] sm:$0xff]  ;;  %v3368_v40 = vld [vmem:[%s5439_s3 + $0x238] sm:$0xff] }
 0x111   : > { %1718 = vmatmul.f32.vlgmr.msrb.gmra.mxu1 %v4005_v25  ;;  %1753 = vmatpush.msrb.mxu2 %v4552_v4  ;;  %v4725_v22 = vand.u32 4294901760, %v3371_v61 }
 0x112   : > { %1919 = vmatpush.msra.mxu1 %v4334_v63  ;;  %1667 = vmatpush.msrb.mxu0 %v5549_v27 }
 0x113   : > { %1852 = vmatpush.msrb.mxu3 %v1851_v42  ;;  %1759 = vmatmul.f32.vlgmr.msrb.gmra.mxu2 %v4078_v38 }
 0x114   : > { %1921 = vmatpush.msra.mxu1 %v4342_v24  ;;  %1960 = vmatpush.msra.mxu2 %v5550_v56 }
 0x115   : > { %1671 = vmatpush.msrb.mxu0 %v5551_v34  ;;  %1858 = vmatpush.msrb.mxu3 %v1857_v3 }
 0x116   : > { %1860 = vmatmul.f32.vlgmr.msrb.gmra.mxu3 %v4035_v14  ;;  %1923 = vmatpush.msra.mxu1 %v4361_v29 }
 0x117   : > { %1964 = vmatpush.msra.mxu2 %v5552_v62  ;;  %2027 = vmatpush.msra.mxu3 %v4334_v63  ;;  %v5558_v63 = vld [vmem:[#allocation8_spill] sm:$0xff]  ;;  %v3366_v62 = vld [vmem:[%s5439_s3 + $0x228] sm:$0xff] }
 0x118   : > { %1675 = vmatpush.msrb.mxu0 %v5553_v18  ;;  %1925 = vmatpush.msra.mxu1 %v4372_v6  ;;  %v5559_v49 = vand.u32 4294901760, %v5558_v63  ;;  %v5565_v18 = vld [vmem:[#allocation6_spill] sm:$0xff] }
 0x119   : > { %1968 = vmatpush.msra.mxu2 %v5554_v8  ;;  %2029 = vmatpush.msra.mxu3 %v4342_v24  ;;  %v5560_v24 = vld [vmem:[#allocation9_spill] sm:$0xff] }
 0x11a   : > { %1679 = vmatpush.msrb.mxu0 %v5555_v15  ;;  %1927 = vmatpush.msra.mxu1 %v4379_v21  ;;  %v5561_v35 = vand.u32 4294901760, %v5560_v24 }
 0x11b   : > { %1681 = vmatmul.f32.vlgmr.msrb.gmra.mxu0 %v4005_v25  ;;  %1972 = vmatpush.msra.mxu2 %v5557_v10  ;;  %v4808_v10 = vand.u32 4294901760, %v3366_v62 }
 0x11c   : > { %1866 = vmatpush.msra.mxu0 %v4354_v51  ;;  %2031 = vmatpush.msra.mxu3 %v4361_v29  ;;  %v3375_v29 = vld [vmem:[%s5439_s3 + $0x270] sm:$0xff]  ;;  %v4658_v51 = vand.u32 4294901760, %v3376_v17 }
 0x11d   : > { %1929 = vmatpush.msra.mxu1 %v4388_v44  ;;  %1976 = vmatpush.msra.mxu2 %v5559_v49  ;;  %v4668_v1 = vand.u32 4294901760, %v3375_v29  ;;  %v3364_v49 = vld [vmem:[%s5439_s3 + $0x218] sm:$0xff] }
 0x11e   : > { %1869 = vmatpush.msra.mxu0 %v4368_v9  ;;  %2033 = vmatpush.msra.mxu3 %v4372_v6  ;;  %v5562_v9 = vand.u32 4294901760, %v4441_v36  ;;  %v3374_v6 = vld [vmem:[%s5439_s3 + $0x268] sm:$0xff]  ;;  %v4679_v43 = vsub.f32 %v3376_v17, %v4658_v51 }
 0x11f   : > { %1931 = vmatpush.msra.mxu1 %v4411_v31  ;;  %1980 = vmatpush.msra.mxu2 %v5561_v35  ;;  %v4681_v59 = vand.u32 4294901760, %v3374_v6 }
 0x120   : > { %1872 = vmatpush.msra.mxu0 %v4384_v30  ;;  %2035 = vmatpush.msra.mxu3 %v4379_v21  ;;  %v5563_v21 = vand.u32 4294901760, %v4457_v5  ;;  %v3373_v30 = vld [vmem:[%s5439_s3 + $0x260] sm:$0xff]  ;;  %v5504_v2 = vand.u32 4294901760, %v4679_v43 }
 0x121   : > { %1933 = vmatpush.msra.mxu1 %v4427_v53  ;;  %1984 = vmatpush.msra.mxu2 %v5562_v9  ;;  %v4694_v47 = vand.u32 4294901760, %v3373_v30  ;;  %v4703_v50 = vsub.f32 %v3374_v6, %v4681_v59  ;;  %v4836_v9 = vsub.f32 %v3366_v62, %v4808_v10  ;;  %v4838_v6 = vand.u32 4294901760, %v3364_v49 }
 0x122   : > { %1875 = vmatpush.msra.mxu0 %v5556_v11  ;;  %2037 = vmatpush.msra.mxu3 %v4388_v44  ;;  %v5564_v44 = vand.u32 4294901760, %v4472_v12  ;;  %v3365_v11 = vld [vmem:[%s5439_s3 + $0x220] sm:$0xff] }
 0x123   : > { %1935 = vmatpush.msra.mxu1 %v4443_v16  ;;  %1988 = vmatpush.msra.mxu2 %v5563_v21 }
 0x124   : > { %1878 = vmatpush.msra.mxu0 %v5558_v63  ;;  %2039 = vmatpush.msra.mxu3 %v4411_v31  ;;  %v4692_v31 = vsub.f32 %v3375_v29, %v4668_v1 }
 0x125   : > { %1937 = vmatpush.msra.mxu1 %v4459_v52  ;;  %1992 = vmatpush.msra.mxu2 %v5564_v44 }
 0x126   : > { %1881 = vmatpush.msra.mxu0 %v5560_v24  ;;  %2041 = vmatpush.msra.mxu3 %v4427_v53  ;;  %v4705_v53 = vand.u32 4294901760, %v3372_v48  ;;  %v4823_v24 = vand.u32 4294901760, %v3365_v11 }
 0x127   : > { %1939 = vmatpush.msra.mxu1 %v4474_v23  ;;  %1996 = vmatpush.msra.mxu2 %v1819_v39  ;;  %v4720_v39 = vsub.f32 %v3373_v30, %v4694_v47  ;;  %v3362_v30 = vld [vmem:[%s5439_s3 + $0x208] sm:$0xff] }
 0x128   : > { %1884 = vmatpush.msra.mxu0 %v4441_v36  ;;  %2043 = vmatpush.msra.mxu3 %v4443_v16  ;;  %v3370_v16 = vld [vmem:[%s5439_s3 + $0x248] sm:$0xff]  ;;  %v5503_v36 = vand.u32 4294901760, %v4692_v31  ;;  %v4737_v54 = vsub.f32 %v3372_v48, %v4705_v53 }
 0x129   : > { %1941 = vmatpush.msra.mxu1 %v4489_v20  ;;  %2000 = vmatpush.msra.mxu2 %v1825_v0  ;;  %v3369_v0 = vld [vmem:[%s5439_s3 + $0x240] sm:$0xff] }
 0x12a   : > { %1887 = vmatpush.msra.mxu0 %v4457_v5  ;;  %2045 = vmatpush.msra.mxu3 %v4459_v52  ;;  %v2140_v5 = vsub.f32 %v4679_v43, %v5504_v2  ;;  %v5502_v52 = vand.u32 4294901760, %v4703_v50  ;;  %v4750_v42 = vand.u32 4294901760, %v3369_v0  ;;  %v5499_v3 = vand.u32 4294901760, %v4737_v54 }
 0x12b   : > { %1943 = vmatpush.msra.mxu1 %v4505_v41  ;;  %2004 = vmatpush.msra.mxu2 %v1831_v19  ;;  %v4739_v19 = vand.u32 4294901760, %v3370_v16 }
 0x12c   : > { %1890 = vmatpush.msra.mxu0 %v4472_v12  ;;  %2047 = vmatpush.msra.mxu3 %v4474_v23  ;;  %v2146_v12 = vsub.f32 %v4692_v31, %v5503_v36  ;;  %v5500_v23 = vand.u32 4294901760, %v4720_v39  ;;  %v4784_v34 = vsub.f32 %v3369_v0, %v4750_v42  ;;  %v2164_v8 = vsub.f32 %v4737_v54, %v5499_v3  ;;  %v3361_v0 = vld [vmem:[%s5439_s3 + $0x200] sm:$0xff] }
 0x12d   : > { %1945 = vmatpush.msra.mxu1 %v4518_v33  ;;  %2008 = vmatpush.msra.mxu2 %v1837_v55  ;;  %v2152_v55 = vsub.f32 %v4703_v50, %v5502_v52  ;;  %v4768_v27 = vsub.f32 %v3370_v16, %v4739_v19  ;;  %v4880_v62 = vand.u32 4294901760, %v3361_v0  ;;  %v3383_v52 = vld [vmem:[%s5439_s3 + $0x2b0] sm:$0xff] }
 0x12e   : > { %1893 = vmatpush.msra.mxu0 %v4487_v13  ;;  %2049 = vmatpush.msra.mxu3 %v4489_v20  ;;  %v4759_v13 = vsub.f32 %v3371_v61, %v4725_v22  ;;  %v2141_v20 = vand.u32 4294901760, %v2140_v5  ;;  %v2158_v56 = vsub.f32 %v4720_v39, %v5500_v23  ;;  %v5495_v63 = vand.u32 4294901760, %v4784_v34  ;;  %v5566_v5 = vld [vmem:[#allocation5_spill] sm:$0xff]  ;;  %v5570_v23 = vld [vmem:[#allocation2_spill] sm:$0xff] }
 0x12f   : > { %1947 = vmatpush.msra.mxu1 %v4539_v37  ;;  %2012 = vmatpush.msra.mxu2 %v1843_v7  ;;  %v3367_v7 = vld [vmem:[%s5439_s3 + $0x230] sm:$0xff]  ;;  %v5497_v15 = vand.u32 4294901760, %v4768_v27  ;;  %v2165_v35 = vand.u32 4294901760, %v2164_v8  ;;  %v4851_v61 = vsub.f32 %v3365_v11, %v4823_v24 }
 0x130   : > { %1896 = vmatpush.msra.mxu0 %v4503_v57  ;;  %2051 = vmatpush.msra.mxu3 %v4505_v41  ;;  %v4776_v41 = vand.u32 4294901760, %v3368_v40  ;;  %v2147_v57 = vand.u32 4294901760, %v2146_v12  ;;  %v2182_v21 = vsub.f32 %v4784_v34, %v5495_v63  ;;  %v3385_v63 = vld [vmem:[%s5439_s3 + $0x2c0] sm:$0xff] }
 0x131   : > { %1949 = vmatpush.msra.mxu1 %v4552_v4  ;;  %2016 = vmatpush.msra.mxu2 %v1849_v26  ;;  %v2153_v26 = vand.u32 4294901760, %v2152_v55  ;;  %v2176_v29 = vsub.f32 %v4768_v27, %v5497_v15  ;;  %v3384_v15 = vld [vmem:[%s5439_s3 + $0x2b8] sm:$0xff]  ;;  %v5015_v3 = vand.u32 4294901760, %v3385_v63 }
 0x132   : > { %1899 = vmatpush.msra.mxu0 %v4516_v28  ;;  %2053 = vmatpush.msra.mxu3 %v4518_v33  ;;  %v5498_v28 = vand.u32 4294901760, %v4759_v13  ;;  %v4793_v33 = vand.u32 4294901760, %v3367_v7  ;;  %v2183_v55 = vand.u32 4294901760, %v2182_v21  ;;  %v5031_v2 = vand.u32 4294901760, %v3384_v15 }
 0x133   : > { %1953 = vmatmul.f32.vlgmr.msra.gmra.mxu1 %v5565_v18  ;;  %2020 = vmatpush.msra.mxu2 %v1855_v60  ;;  %v4806_v60 = vsub.f32 %v3368_v40, %v4776_v41  ;;  %v2177_v16 = vand.u32 4294901760, %v2176_v29  ;;  %v5492_v40 = vand.u32 4294901760, %v4836_v9  ;;  %v4900_v29 = vsub.f32 %v3361_v0, %v4880_v62 }
 0x134   : > { %2142 = vmatpush.msrb.mxu1 %v2141_v20  ;;  %1902 = vmatpush.msra.mxu0 %v4532_v45  ;;  %v2159_v45 = vand.u32 4294901760, %v2158_v56  ;;  %v4821_v17 = vsub.f32 %v3367_v7, %v4793_v33  ;;  %v4866_v20 = vsub.f32 %v3364_v49, %v4838_v6 }
 0x135   : > { %2055 = vmatpush.msra.mxu3 %v4539_v37  ;;  %2022 = vmatmul.f32.vlgmr.msra.gmra.mxu2 %v4035_v14  ;;  %v2170_v37 = vsub.f32 %v4759_v13, %v5498_v28  ;;  %v2200_v8 = vsub.f32 %v4836_v9, %v5492_v40 }
 0x136   : > { %2148 = vmatpush.msrb.mxu1 %v2147_v57  ;;  %2240 = vmatpush.msrb.mxu2 %v4679_v43  ;;  %v5493_v48 = vand.u32 4294901760, %v4821_v17  ;;  %v5491_v57 = vand.u32 4294901760, %v4851_v61  ;;  %v5489_v11 = vand.u32 4294901760, %v4866_v20 }
 0x137   : > { %1905 = vmatpush.msra.mxu0 %v4548_v32  ;;  %2057 = vmatpush.msra.mxu3 %v4552_v4  ;;  %v3363_v32 = vld [vmem:[%s5439_s3 + $0x210] sm:$0xff]  ;;  %v5494_v4 = vand.u32 4294901760, %v4806_v60  ;;  %v2171_v44 = vand.u32 4294901760, %v2170_v37  ;;  %v2201_v21 = vand.u32 4294901760, %v2200_v8 }
 0x138   : > { %2059 = vmatmul.f32.vlgmr.msra.gmra.mxu3 %v4035_v14  ;;  %2154 = vmatpush.msrb.mxu1 %v2153_v26  ;;  %v2194_v7 = vsub.f32 %v4821_v17, %v5493_v48  ;;  %v2206_v37 = vsub.f32 %v4851_v61, %v5491_v57  ;;  %v3387_v57 = vld [vmem:[%s5439_s3 + $0x2d0] sm:$0xff] }
 0x139   : > { %2243 = vmatpush.msrb.mxu2 %v4692_v31  ;;  %2293 = vmatpush.msrb.mxu3 %v4658_v51  ;;  %v2188_v12 = vsub.f32 %v4806_v60, %v5494_v4 }
 0x13a   : > { %1908 = vmatpush.msra.mxu0 %v4563_v58  ;;  %2160 = vmatpush.msrb.mxu1 %v2159_v45  ;;  %v4853_v58 = vand.u32 4294901760, %v3363_v32  ;;  %v2195_v49 = vand.u32 4294901760, %v2194_v7  ;;  %v2207_v0 = vand.u32 4294901760, %v2206_v37  ;;  %v3390_v37 = vld [vmem:[%s5439_s3 + $0x2e8] sm:$0xff] }
 0x13b   : > { %2246 = vmatpush.msrb.mxu2 %v4703_v50  ;;  %2295 = vmatpush.msrb.mxu3 %v4668_v1  ;;  %v2189_v26 = vand.u32 4294901760, %v2188_v12 }
 0x13c   : > { %1911 = vmatpush.msra.mxu0 %v4574_v46  ;;  %2166 = vmatpush.msrb.mxu1 %v2165_v35  ;;  %v4868_v46 = vand.u32 4294901760, %v3362_v30  ;;  %v4878_v56 = vsub.f32 %v3363_v32, %v4853_v58  ;;  %v3392_v32 = vld [vmem:[%s5439_s3 + $0x2f8] sm:$0xff] }
 0x13d   : > { %1914 = vmatmul.f32.vlgmr.msra.gmra.mxu0 %v5566_v5  ;;  %2249 = vmatpush.msrb.mxu2 %v4720_v39  ;;  %v4922_v7 = vand.u32 4294901760, %v3392_v32  ;;  %v5047_v5 = vand.u32 4294901760, %v3383_v52 }
 0x13e   : > { %2097 = vmatpush.msrb.mxu0 %v4658_v51  ;;  %2297 = vmatpush.msrb.mxu3 %v4681_v59  ;;  %v4890_v45 = vsub.f32 %v3362_v30, %v4868_v46  ;;  %v5488_v35 = vand.u32 4294901760, %v4878_v56  ;;  %v2212_v30 = vsub.f32 %v4866_v20, %v5489_v11  ;;  %v4949_v11 = vand.u32 4294901760, %v3390_v37 }
 0x13f   : > { %2172 = vmatpush.msrb.mxu1 %v2171_v44  ;;  %2252 = vmatpush.msrb.mxu2 %v4737_v54 }
 0x140   : > { %2099 = vmatpush.msrb.mxu0 %v4668_v1  ;;  %2299 = vmatpush.msrb.mxu3 %v4694_v47  ;;  %v5487_v44 = vand.u32 4294901760, %v4890_v45  ;;  %v2218_v12 = vsub.f32 %v4878_v56, %v5488_v35  ;;  %v3389_v35 = vld [vmem:[%s5439_s3 + $0x2e0] sm:$0xff] }
 0x141   : > { %2178 = vmatpush.msrb.mxu1 %v2177_v16  ;;  %2255 = vmatpush.msrb.mxu2 %v4759_v13  ;;  %v3391_v16 = vld [vmem:[%s5439_s3 + $0x2f0] sm:$0xff] }
 0x142   : > { %2101 = vmatpush.msrb.mxu0 %v4681_v59  ;;  %2301 = vmatpush.msrb.mxu3 %v4705_v53  ;;  %v2224_v8 = vsub.f32 %v4890_v45, %v5487_v44  ;;  %v4942_v44 = vsub.f32 %v3392_v32, %v4922_v7 }
 0x143   : > { %2184 = vmatpush.msrb.mxu1 %v2183_v55  ;;  %2258 = vmatpush.msrb.mxu2 %v4768_v27  ;;  %v5490_v55 = vand.u32 4294901760, %v4900_v29 }
 0x144   : > { %2103 = vmatpush.msrb.mxu0 %v4694_v47  ;;  %2303 = vmatpush.msrb.mxu3 %v4725_v22  ;;  %v5496_v40 = vand.u32 4294901760, %v4942_v44 }
 0x145   : > { %2190 = vmatpush.msrb.mxu1 %v2189_v26  ;;  %2261 = vmatpush.msrb.mxu2 %v4784_v34  ;;  %v2213_v26 = vand.u32 4294901760, %v2212_v30  ;;  %v2230_v30 = vsub.f32 %v4900_v29, %v5490_v55  ;;  %v4960_v55 = vand.u32 4294901760, %v3389_v35 }
 0x146   : > { %2105 = vmatpush.msrb.mxu0 %v4705_v53  ;;  %2305 = vmatpush.msrb.mxu3 %v4739_v19 }
 0x147   : > { %2196 = vmatpush.msrb.mxu1 %v2195_v49  ;;  %2264 = vmatpush.msrb.mxu2 %v4806_v60  ;;  %v4930_v49 = vand.u32 4294901760, %v3391_v16  ;;  %v4984_v4 = vsub.f32 %v3389_v35, %v4960_v55 }
 0x148   : > { %2107 = vmatpush.msrb.mxu0 %v4725_v22  ;;  %2307 = vmatpush.msrb.mxu3 %v4750_v42 }
 0x149   : > { %2202 = vmatpush.msrb.mxu1 %v2201_v21  ;;  %2267 = vmatpush.msrb.mxu2 %v4821_v17  ;;  %v2219_v21 = vand.u32 4294901760, %v2218_v12  ;;  %v2225_v12 = vand.u32 4294901760, %v2224_v8  ;;  %v4956_v32 = vsub.f32 %v3391_v16, %v4930_v49  ;;  %v4972_v16 = vsub.f32 %v3390_v37, %v4949_v11  ;;  %5567 = vst [vmem:[#allocation7_spill] sm:$0xff] %v4984_v4 }
 0x14a   : > { %2109 = vmatpush.msrb.mxu0 %v4739_v19  ;;  %2309 = vmatpush.msrb.mxu3 %v4776_v41  ;;  %v2481_v37 = vsub.f32 %v4942_v44, %v5496_v40  ;;  %v5506_v28 = vand.u32 4294901760, %v4984_v4 }
 0x14b   : > { %2208 = vmatpush.msrb.mxu1 %v2207_v0  ;;  %2270 = vmatpush.msrb.mxu2 %v4836_v9  ;;  %v3388_v0 = vld [vmem:[%s5439_s3 + $0x2d8] sm:$0xff]  ;;  %v5501_v48 = vand.u32 4294901760, %v4956_v32  ;;  %v5505_v35 = vand.u32 4294901760, %v4972_v16 }
 0x14c   : > { %2111 = vmatpush.msrb.mxu0 %v4750_v42  ;;  %2311 = vmatpush.msrb.mxu3 %v4793_v33  ;;  %v4967_v8 = vand.u32 4294901760, %v3388_v0 }
 0x14d   : > { %2214 = vmatpush.msrb.mxu1 %v2213_v26  ;;  %2273 = vmatpush.msrb.mxu2 %v4851_v61  ;;  %v2231_v26 = vand.u32 4294901760, %v2230_v30  ;;  %v3386_v30 = vld [vmem:[%s5439_s3 + $0x2c8] sm:$0xff] }
 0x14e   : > { %2113 = vmatpush.msrb.mxu0 %v4776_v41  ;;  %2313 = vmatpush.msrb.mxu3 %v4808_v10 }
 0x14f   : > { %2220 = vmatpush.msrb.mxu1 %v2219_v21  ;;  %2276 = vmatpush.msrb.mxu2 %v4866_v20  ;;  %v4976_v21 = vand.u32 4294901760, %v3387_v57 }
 0x150   : > { %2115 = vmatpush.msrb.mxu0 %v4793_v33  ;;  %2315 = vmatpush.msrb.mxu3 %v4823_v24 }
 0x151   : > { %2226 = vmatpush.msrb.mxu1 %v2225_v12  ;;  %2279 = vmatpush.msrb.mxu2 %v4878_v56  ;;  %v4991_v12 = vsub.f32 %v3388_v0, %v4967_v8  ;;  %v2487_v0 = vsub.f32 %v4956_v32, %v5501_v48  ;;  %v5007_v40 = vsub.f32 %v3387_v57, %v4976_v21  ;;  %v2482_v48 = vand.u32 4294901760, %v2481_v37  ;;  %v5571_v57 = vld [vmem:[#allocation3_spill] sm:$0xff] }
 0x152   : > { %2117 = vmatpush.msrb.mxu0 %v4808_v10  ;;  %2317 = vmatpush.msrb.mxu3 %v4838_v6 }
 0x153   : > { %2232 = vmatpush.msrb.mxu1 %v2231_v26  ;;  %2282 = vmatpush.msrb.mxu2 %v4890_v45  ;;  %5568 = vst [vmem:[#allocation8_spill] sm:$0xff] %v4991_v12  ;;  %v4999_v26 = vand.u32 4294901760, %v3386_v30 }
 0x154   : > { %2119 = vmatpush.msrb.mxu0 %v4823_v24  ;;  %2319 = vmatpush.msrb.mxu3 %v4853_v58  ;;  %5569 = vst [vmem:[#allocation9_spill] sm:$0xff] %v5007_v40 }
 0x155   : > { %2234 = vmatmul.f32.vlgmr.msrb.gmra.mxu1 %v4005_v25  ;;  %2285 = vmatpush.msrb.mxu2 %v4900_v29  ;;  %v5029_v36 = vsub.f32 %v3386_v30, %v4999_v26  ;;  %v2499_v30 = vsub.f32 %v4984_v4, %v5506_v28  ;;  %v5060_v28 = vsub.f32 %v3384_v15, %v5031_v2  ;;  %v5575_v4 = vand.u32 4294901760, %v4679_v43 }
 0x156   : > { %2401 = vmatpush.msra.mxu1 %v4658_v51  ;;  %2121 = vmatpush.msrb.mxu0 %v4838_v6  ;;  %v2493_v51 = vsub.f32 %v4972_v16, %v5505_v35  ;;  %v5045_v35 = vsub.f32 %v3385_v63, %v5015_v3  ;;  %v5577_v43 = vand.u32 4294901760, %v4692_v31  ;;  %v5579_v31 = vand.u32 4294901760, %v4703_v50 }
 0x157   : > { %2321 = vmatpush.msrb.mxu3 %v4868_v46  ;;  %2288 = vmatmul.f32.vlgmr.msrb.gmra.mxu2 %v5570_v23  ;;  %v2488_v23 = vand.u32 4294901760, %v2487_v0  ;;  %v5572_v0 = vand.u32 4294901760, %v4991_v12 }
 0x158   : > { %2403 = vmatpush.msra.mxu1 %v4668_v1  ;;  %2438 = vmatpush.msra.mxu2 %v4922_v7  ;;  %v3382_v1 = vld [vmem:[%s5439_s3 + $0x2a8] sm:$0xff] }
 0x159   : > { %2123 = vmatpush.msrb.mxu0 %v4853_v58  ;;  %2323 = vmatpush.msrb.mxu3 %v4880_v62  ;;  %v2505_v37 = vsub.f32 %v4991_v12, %v5572_v0  ;;  %v5062_v18 = vand.u32 4294901760, %v3382_v1  ;;  %v3380_v12 = vld [vmem:[%s5439_s3 + $0x298] sm:$0xff] }
 0x15a   : > { %2327 = vmatmul.f32.vlgmr.msrb.gmra.mxu3 %v5571_v57  ;;  %2405 = vmatpush.msra.mxu1 %v4681_v59  ;;  %v3381_v59 = vld [vmem:[%s5439_s3 + $0x2a0] sm:$0xff]  ;;  %v2494_v57 = vand.u32 4294901760, %v2493_v51  ;;  %v5075_v51 = vsub.f32 %v3383_v52, %v5047_v5 }
 0x15b   : > { %2440 = vmatpush.msra.mxu2 %v4930_v49  ;;  %2483 = vmatpush.msra.mxu3 %v2482_v48  ;;  %v5573_v48 = vand.u32 4294901760, %v5007_v40  ;;  %v5077_v63 = vand.u32 4294901760, %v3381_v59  ;;  %v5091_v15 = vsub.f32 %v3382_v1, %v5062_v18 }
 0x15c   : > { %2125 = vmatpush.msrb.mxu0 %v4868_v46  ;;  %2407 = vmatpush.msra.mxu1 %v4694_v47  ;;  %v2500_v47 = vand.u32 4294901760, %v2499_v30 }
 0x15d   : > { %2442 = vmatpush.msra.mxu2 %v4949_v11  ;;  %2489 = vmatpush.msra.mxu3 %v2488_v23  ;;  %v2511_v0 = vsub.f32 %v5007_v40, %v5573_v48  ;;  %v5574_v23 = vld [vmem:[#allocation4_spill] sm:$0xff]  ;;  %v2506_v48 = vand.u32 4294901760, %v2505_v37  ;;  %v5104_v1 = vsub.f32 %v3381_v59, %v5077_v63 }
 0x15e   : > { %2127 = vmatpush.msrb.mxu0 %v4880_v62  ;;  %2409 = vmatpush.msra.mxu1 %v4705_v53  ;;  %v3379_v40 = vld [vmem:[%s5439_s3 + $0x290] sm:$0xff]  ;;  %v5576_v53 = vand.u32 4294901760, %v5029_v36 }
 0x15f   : > { %2133 = vmatmul.f32.vlgmr.msrb.gmra.mxu0 %v5574_v23  ;;  %2444 = vmatpush.msra.mxu2 %v4960_v55  ;;  %v5093_v23 = vand.u32 4294901760, %v3380_v12  ;;  %v2512_v37 = vand.u32 4294901760, %v2511_v0  ;;  %v5106_v30 = vand.u32 4294901760, %v3379_v40 }
 0x160   : > { %2334 = vmatpush.msra.mxu0 %v5575_v4  ;;  %2495 = vmatpush.msra.mxu3 %v2494_v57  ;;  %v2517_v52 = vsub.f32 %v5029_v36, %v5576_v53  ;;  %v5578_v4 = vand.u32 4294901760, %v5045_v35  ;;  %v2534_v53 = vand.u32 4294901760, %v5075_v51 }
 0x161   : > { %2411 = vmatpush.msra.mxu1 %v4725_v22  ;;  %2446 = vmatpush.msra.mxu2 %v4967_v8  ;;  %v3378_v22 = vld [vmem:[%s5439_s3 + $0x288] sm:$0xff] }
 0x162   : > { %2338 = vmatpush.msra.mxu0 %v5577_v43  ;;  %2501 = vmatpush.msra.mxu3 %v2500_v47  ;;  %v2523_v57 = vsub.f32 %v5045_v35, %v5578_v4  ;;  %v2518_v0 = vand.u32 4294901760, %v2517_v52  ;;  %v5580_v47 = vand.u32 4294901760, %v5060_v28  ;;  %v2540_v43 = vand.u32 4294901760, %v5091_v15 }
 0x163   : > { %2413 = vmatpush.msra.mxu1 %v4739_v19  ;;  %2448 = vmatpush.msra.mxu2 %v4976_v21  ;;  %v5120_v4 = vsub.f32 %v3380_v12, %v5093_v23  ;;  %v3377_v19 = vld [vmem:[%s5439_s3 + $0x280] sm:$0xff]  ;;  %v5127_v50 = vand.u32 4294901760, %v3378_v22  ;;  %v2535_v12 = vsub.f32 %v5075_v51, %v2534_v53 }
 0x164   : > { %2342 = vmatpush.msra.mxu0 %v5579_v31  ;;  %2507 = vmatpush.msra.mxu3 %v2506_v48  ;;  %v2529_v59 = vsub.f32 %v5060_v28, %v5580_v47  ;;  %v5581_v48 = vand.u32 4294901760, %v4720_v39  ;;  %v2524_v52 = vand.u32 4294901760, %v2523_v57  ;;  %v2546_v31 = vand.u32 4294901760, %v5104_v1 }
 0x165   : > { %2415 = vmatpush.msra.mxu1 %v4750_v42  ;;  %2450 = vmatpush.msra.mxu2 %v4999_v26  ;;  %v5136_v47 = vsub.f32 %v3379_v40, %v5106_v30  ;;  %v5140_v42 = vand.u32 4294901760, %v3377_v19  ;;  %v5582_v39 = vand.u32 4294901760, %v4737_v54  ;;  %v2541_v57 = vsub.f32 %v5091_v15, %v2540_v43 }
 0x166   : > { %2346 = vmatpush.msra.mxu0 %v5581_v48  ;;  %2513 = vmatpush.msra.mxu3 %v2512_v37  ;;  %v2530_v37 = vand.u32 4294901760, %v2529_v59  ;;  %v2552_v48 = vand.u32 4294901760, %v5120_v4  ;;  %v5583_v40 = vand.u32 4294901760, %v4759_v13  ;;  %v2536_v54 = vand.u32 4294901760, %v2535_v12 }
 0x167   : > { %2417 = vmatpush.msra.mxu1 %v4776_v41  ;;  %2452 = vmatpush.msra.mxu2 %v5015_v3  ;;  %v5151_v41 = vsub.f32 %v3378_v22, %v5127_v50  ;;  %v2558_v59 = vand.u32 4294901760, %v5136_v47  ;;  %v5584_v22 = vand.u32 4294901760, %v4768_v27  ;;  %v2542_v13 = vand.u32 4294901760, %v2541_v57 }
 0x168   : > { %2350 = vmatpush.msra.mxu0 %v5582_v39  ;;  %2519 = vmatpush.msra.mxu3 %v2518_v0  ;;  %v2547_v0 = vsub.f32 %v5104_v1, %v2546_v31  ;;  %v5585_v12 = vand.u32 4294901760, %v4784_v34  ;;  %v5587_v57 = vand.u32 4294901760, %v4821_v17 }
 0x169   : > { %2419 = vmatpush.msra.mxu1 %v4793_v33  ;;  %2454 = vmatpush.msra.mxu2 %v5031_v2  ;;  %v5162_v33 = vsub.f32 %v3377_v19, %v5140_v42  ;;  %v2559_v27 = vsub.f32 %v5136_v47, %v2558_v59 }
 0x16a   : > { %2354 = vmatpush.msra.mxu0 %v5583_v40  ;;  %2525 = vmatpush.msra.mxu3 %v2524_v52  ;;  %v2553_v52 = vsub.f32 %v5120_v4, %v2552_v48  ;;  %v2548_v19 = vand.u32 4294901760, %v2547_v0  ;;  %v5589_v40 = vand.u32 4294901760, %v4851_v61  ;;  %v5592_v61 = vand.u32 4294901760, %v4878_v56  ;;  %v5597_v0 = vld [vmem:[#allocation7_spill] sm:$0xff] }
 0x16b   : > { %2421 = vmatpush.msra.mxu1 %v4808_v10  ;;  %2456 = vmatpush.msra.mxu2 %v5047_v5  ;;  %v2564_v10 = vand.u32 4294901760, %v5151_v41  ;;  %v2570_v39 = vand.u32 4294901760, %v5162_v33  ;;  %v5596_v56 = vand.u32 4294901760, %v4900_v29  ;;  %v5601_v29 = vld [vmem:[#allocation9_spill] sm:$0xff] }
 0x16c   : > { %2358 = vmatpush.msra.mxu0 %v5584_v22  ;;  %2531 = vmatpush.msra.mxu3 %v2530_v37  ;;  %v2554_v37 = vand.u32 4294901760, %v2553_v52  ;;  %v5598_v22 = vand.u32 4294901760, %v5597_v0 }
 0x16d   : > { %2423 = vmatpush.msra.mxu1 %v4823_v24  ;;  %2458 = vmatpush.msra.mxu2 %v5062_v18  ;;  %v5586_v24 = vand.u32 4294901760, %v4806_v60  ;;  %v2565_v34 = vsub.f32 %v5151_v41, %v2564_v10  ;;  %v2571_v60 = vsub.f32 %v5162_v33, %v2570_v39 }
 0x16e   : > { %2362 = vmatpush.msra.mxu0 %v5585_v12  ;;  %2537 = vmatpush.msra.mxu3 %v2536_v54  ;;  %v5593_v54 = vand.u32 4294901760, %v4956_v32 }
 0x16f   : > { %2425 = vmatpush.msra.mxu1 %v4838_v6  ;;  %2460 = vmatpush.msra.mxu2 %v5077_v63  ;;  %v2560_v6 = vand.u32 4294901760, %v2559_v27  ;;  %v2566_v17 = vand.u32 4294901760, %v2565_v34 }
 0x170   : > { %2366 = vmatpush.msra.mxu0 %v5586_v24  ;;  %2543 = vmatpush.msra.mxu3 %v2542_v13 }
 0x171   : > { %2427 = vmatpush.msra.mxu1 %v4853_v58  ;;  %2462 = vmatpush.msra.mxu2 %v5093_v23  ;;  %v5588_v58 = vand.u32 4294901760, %v4836_v9  ;;  %v5590_v9 = vand.u32 4294901760, %v4866_v20  ;;  %v5595_v20 = vand.u32 4294901760, %v4972_v16 }
 0x172   : > { %2370 = vmatpush.msra.mxu0 %v5587_v57  ;;  %2549 = vmatpush.msra.mxu3 %v2548_v19 }
 0x173   : > { %2429 = vmatpush.msra.mxu1 %v4868_v46  ;;  %2464 = vmatpush.msra.mxu2 %v5106_v30  ;;  %v2572_v46 = vand.u32 4294901760, %v2571_v60 }
 0x174   : > { %2374 = vmatpush.msra.mxu0 %v5588_v58  ;;  %2555 = vmatpush.msra.mxu3 %v2554_v37 }
 0x175   : > { %2431 = vmatpush.msra.mxu1 %v4880_v62  ;;  %2466 = vmatpush.msra.mxu2 %v5127_v50  ;;  %v5591_v62 = vand.u32 4294901760, %v4942_v44 }
 0x176   : > { %2378 = vmatpush.msra.mxu0 %v5589_v40  ;;  %2561 = vmatpush.msra.mxu3 %v2560_v6 }
 0x177   : > { %2433 = vmatmul.f32.vlgmr.msra.gmra.mxu1 %v4005_v25  ;;  %2468 = vmatpush.msra.mxu2 %v5140_v42 }
 0x178   : > { %2634 = vmatpush.msrb.mxu1 %v4922_v7  ;;  %2382 = vmatpush.msra.mxu0 %v5590_v9 }
 0x179   : > { %2567 = vmatpush.msra.mxu3 %v2566_v17  ;;  %2474 = vmatmul.f32.vlgmr.msra.gmra.mxu2 %v4078_v38  ;;  %v5594_v38 = vand.u32 4294901760, %v4890_v45  ;;  %v5599_v45 = vld [vmem:[#allocation8_spill] sm:$0xff] }
 0x17a   : > { %2636 = vmatpush.msrb.mxu1 %v4930_v49  ;;  %2675 = vmatpush.msrb.mxu2 %v5591_v62 }
 0x17b   : > { %2386 = vmatpush.msra.mxu0 %v5592_v61  ;;  %2573 = vmatpush.msra.mxu3 %v2572_v46 }
 0x17c   : > { %2575 = vmatmul.f32.vlgmr.msra.gmra.mxu3 %v4035_v14  ;;  %2638 = vmatpush.msrb.mxu1 %v4949_v11 }
 0x17d   : > { %2679 = vmatpush.msrb.mxu2 %v5593_v54  ;;  %2742 = vmatpush.msrb.mxu3 %v4922_v7  ;;  %v5600_v7 = vand.u32 4294901760, %v5599_v45 }
 0x17e   : > { %2390 = vmatpush.msra.mxu0 %v5594_v38  ;;  %2640 = vmatpush.msrb.mxu1 %v4960_v55 }
 0x17f   : > { %2683 = vmatpush.msrb.mxu2 %v5595_v20  ;;  %2744 = vmatpush.msrb.mxu3 %v4930_v49 }
 0x180   : > { %2394 = vmatpush.msra.mxu0 %v5596_v56  ;;  %2642 = vmatpush.msrb.mxu1 %v4967_v8 }
 0x181   : > { %2396 = vmatmul.f32.vlgmr.msra.gmra.mxu0 %v4005_v25  ;;  %2687 = vmatpush.msrb.mxu2 %v5598_v22  ;;  %v5602_v25 = vand.u32 4294901760, %v5601_v29 }
 0x182   : > { %2581 = vmatpush.msrb.mxu0 %v4942_v44  ;;  %2746 = vmatpush.msrb.mxu3 %v4949_v11  ;;  %v5603_v11 = vand.u32 4294901760, %v5029_v36  ;;  %v5604_v44 = vand.u32 4294901760, %v5045_v35 }
 0x183   : > { %2644 = vmatpush.msrb.mxu1 %v4976_v21  ;;  %2691 = vmatpush.msrb.mxu2 %v5600_v7 }
 0x184   : > { %2584 = vmatpush.msrb.mxu0 %v4956_v32  ;;  %2748 = vmatpush.msrb.mxu3 %v4960_v55  ;;  %v5605_v55 = vand.u32 4294901760, %v5060_v28  ;;  %v898_v32 = vpop.f32.mrf.mxu3 }
 0x185   : > { %2646 = vmatpush.msrb.mxu1 %v4999_v26  ;;  %2695 = vmatpush.msrb.mxu2 %v5602_v25 }
 0x186   : > { %2587 = vmatpush.msrb.mxu0 %v4972_v16  ;;  %2750 = vmatpush.msrb.mxu3 %v4967_v8 }
 0x187   : > { %2648 = vmatpush.msrb.mxu1 %v5015_v3  ;;  %2699 = vmatpush.msrb.mxu2 %v5603_v11 }
 0x188   : > { %2590 = vmatpush.msrb.mxu0 %v5597_v0  ;;  %2752 = vmatpush.msrb.mxu3 %v4976_v21 }
 0x189   : > { %2650 = vmatpush.msrb.mxu1 %v5031_v2  ;;  %2703 = vmatpush.msrb.mxu2 %v5604_v44 }
 0x18a   : > { %2593 = vmatpush.msrb.mxu0 %v5599_v45  ;;  %2754 = vmatpush.msrb.mxu3 %v4999_v26 }
 0x18b   : > { %2652 = vmatpush.msrb.mxu1 %v5047_v5  ;;  %2707 = vmatpush.msrb.mxu2 %v5605_v55 }
 0x18c   : > { %2596 = vmatpush.msrb.mxu0 %v5601_v29  ;;  %2756 = vmatpush.msrb.mxu3 %v5015_v3  ;;  %v704_v3 = vpop.f32.mrf.mxu0  ;;  %v1146_v21 = vpop.f32.mrf.mxu3 }
 0x18d   : > { %2654 = vmatpush.msrb.mxu1 %v5062_v18  ;;  %2711 = vmatpush.msrb.mxu2 %v2534_v53 }
 0x18e   : > { %2599 = vmatpush.msrb.mxu0 %v5029_v36  ;;  %2758 = vmatpush.msrb.mxu3 %v5031_v2  ;;  %v5606_v2 = vld [vmem:[#allocation6_spill] sm:$0xff]  ;;  %v5607_v36 = vld [vmem:[#allocation5_spill] sm:$0xff] }
 0x18f   : > { %2656 = vmatpush.msrb.mxu1 %v5077_v63  ;;  %2715 = vmatpush.msrb.mxu2 %v2540_v43 }
 0x190   : > { %2602 = vmatpush.msrb.mxu0 %v5045_v35  ;;  %2760 = vmatpush.msrb.mxu3 %v5047_v5 }
 0x191   : > { %2658 = vmatpush.msrb.mxu1 %v5093_v23  ;;  %2719 = vmatpush.msrb.mxu2 %v2546_v31 }
 0x192   : > { %2605 = vmatpush.msrb.mxu0 %v5060_v28  ;;  %2762 = vmatpush.msrb.mxu3 %v5062_v18  ;;  %v805_v18 = vpop.f32.mrf.mxu1  ;;  %v859_v28 = vpop.f32.mrf.mxu2 }
 0x193   : > { %2660 = vmatpush.msrb.mxu1 %v5106_v30  ;;  %2723 = vmatpush.msrb.mxu2 %v2552_v48  ;;  %v806_v48 = vadd.f32 %v805_v18, %v704_v3 }
 0x194   : > { %2608 = vmatpush.msrb.mxu0 %v5075_v51  ;;  %2764 = vmatpush.msrb.mxu3 %v5077_v63  ;;  %v967_v5 = vpop.f32.mrf.mxu0 }
 0x195   : > { %2662 = vmatpush.msrb.mxu1 %v5127_v50  ;;  %2727 = vmatpush.msrb.mxu2 %v2558_v59  ;;  %v860_v12 = vadd.f32 %v859_v28, %v806_v48 }
 0x196   : > { %2611 = vmatpush.msrb.mxu0 %v5091_v15  ;;  %2766 = vmatpush.msrb.mxu3 %v5093_v23  ;;  %v1345_v15 = vpop.f32.mrf.mxu3 }
 0x197   : > { %2664 = vmatpush.msrb.mxu1 %v5140_v42  ;;  %2731 = vmatpush.msrb.mxu2 %v2564_v10  ;;  %v899_v24 = vadd.f32 %v898_v32, %v860_v12 }
 0x198   : > { %2614 = vmatpush.msrb.mxu0 %v5104_v1  ;;  %2768 = vmatpush.msrb.mxu3 %v5106_v30 }
 0x199   : > { %2668 = vmatmul.f32.vlgmr.msrb.gmra.mxu1 %v5606_v2  ;;  %2735 = vmatpush.msrb.mxu2 %v2570_v39  ;;  %v968_v37 = vadd.f32 %v967_v5, %v899_v24 }
 0x19a   : > { %2617 = vmatpush.msrb.mxu0 %v5120_v4  ;;  %2770 = vmatpush.msrb.mxu3 %v5127_v50  ;;  %v1004_v49 = vpop.f32.mrf.mxu1  ;;  %v1045_v8 = vpop.f32.mrf.mxu2 }
 0x19b   : > { %2737 = vmatmul.f32.vlgmr.msrb.gmra.mxu2 %v4035_v14  ;;  %v1005_v17 = vadd.f32 %v1004_v49, %v968_v37 }
 0x19c   : > { %2620 = vmatpush.msrb.mxu0 %v5136_v47  ;;  %2772 = vmatpush.msrb.mxu3 %v5140_v42  ;;  %v1200_v16 = vpop.f32.mrf.mxu0 }
 0x19d   : > { %2774 = vmatmul.f32.vlgmr.msrb.gmra.mxu3 %v4035_v14  ;;  %v1046_v46 = vadd.f32 %v1045_v8, %v1005_v17 }
 0x19e   : > { %2623 = vmatpush.msrb.mxu0 %v5151_v41  ;;  %v1613_v23 = vpop.f32.mrf.mxu3 }
 0x19f   : > { %v1147_v54 = vadd.f32 %v1146_v21, %v1046_v46 }
 0x1a0   : > { %2626 = vmatpush.msrb.mxu0 %v5162_v33 }
 0x1a1   : > { %2629 = vmatmul.f32.vlgmr.msrb.gmra.mxu0 %v5607_v36  ;;  %v1201_v0 = vadd.f32 %v1200_v16, %v1147_v54  ;;  %v2788_v16 = vld [vmem:[%s5440_s4] sm:$0x7]  ;;  %v2840_v54 = vld [vmem:[%s5313_s13 + $0x48] sm:$0xf] }
 0x1a2   : > { %v1239_v35 = vpop.f32.mrf.mxu1  ;;  %v1308_v26 = vpop.f32.mrf.mxu2 }
 0x1a3   : > { %v1240_v29 = vadd.f32 %v1239_v35, %v1201_v0 }
 0x1a4   : > { %v1419_v63 = vpop.f32.mrf.mxu0 }
 0x1a5   : > { %v1309_v36 = vadd.f32 %v1308_v26, %v1240_v29  ;;  %v3420_v26 = vmov 36.0  }
 0x1a6   : > { %v1861_v50 = vpop.f32.mrf.mxu3  ;;  %3408 = vrcp.f32 %v3420_v26 }
 0x1a7   : > { %v1346_v32 = vadd.f32 %v1345_v15, %v1309_v36 }
 0x1aa   : > { %v1520_v14 = vpop.f32.mrf.mxu1  ;;  %v1574_v51 = vpop.f32.mrf.mxu2 }
 0x1ab   : > { %v1521_v43 = vadd.f32 %v1520_v14, %v1419_v63 }
 0x1ac   : > { %v1682_v30 = vpop.f32.mrf.mxu0 }
 0x1ad   : > { %v1575_v47 = vadd.f32 %v1574_v51, %v1521_v43  ;;  %v3409_v51 = vpop.eup %3408 }
 0x1ae   : > { %vm2799_vm5 = vweird.f32 %v3409_v51 }
 0x1af   : > { %v1614_v41 = vadd.f32 %v1613_v23, %v1575_v47 }
 0x1b1   : > { %v1683_v33 = vadd.f32 %v1682_v30, %v1614_v41  ;;  %v2795_v30 = vmul.f32 36.0, %v3409_v51 }
 0x1b2   : > { %v1719_v53 = vpop.f32.mrf.mxu1  ;;  %v1760_v1 = vpop.f32.mrf.mxu2 }
 0x1b3   : > { %v1720_v19 = vadd.f32 %v1719_v53, %v1683_v33  ;;  %v2796_v23 = vsub.f32 1.0, %v2795_v30 }
 0x1b5   : > { %v1761_v34 = vadd.f32 %v1760_v1, %v1720_v19  ;;  %v2797_v15 = vmul.f32 %v3409_v51, %v2796_v23 }
 0x1b7   : > { %v1862_v40 = vadd.f32 %v1861_v50, %v1761_v34  ;;  %v2798_v53 = vadd.f32 %v3409_v51, %v2797_v15 }
 0x1b9   : > { %v5301_v1 = vsel %vm2799_vm5, %v3409_v51, %v2798_v53 }
 0x1ba   : > { %v1915_v4 = vpop.f32.mrf.mxu0  ;;  %v1954_v31 = vpop.f32.mrf.mxu1 }
 0x1bb   : > { %v2023_v42 = vpop.f32.mrf.mxu2  ;;  %v2060_v13 = vpop.f32.mrf.mxu3  ;;  %v1916_v9 = vadd.f32 %v1915_v4, %v1862_v40 }
 0x1bd   : > { %v1955_v38 = vadd.f32 %v1954_v31, %v1916_v9 }
 0x1bf   : > { %v2024_v22 = vadd.f32 %v2023_v42, %v1955_v38  ;;  %v2839_v42 = vld [vmem:[%s5313_s13 + $0x40] sm:$0xf] }
 0x1c0   : > { %v2847_v48 = vsel %vm2845_vm6, %v2839_v42, 0 }
 0x1c1   : > { %v2061_v44 = vadd.f32 %v2060_v13, %v2024_v22  ;;  %v5317_v41 = vand.u32 4294901760, %v2847_v48 }
 0x1c3   : > { %v2779_v28 = vrot.slane %v2061_v44, 7  ;;  %v2894_v33 = vsub.f32 %v2847_v48, %v5317_v41  ;;  %2972 = vmatpush.msra.mxu3 %v5317_v41  ;;  %2864 = vmatpush.msra.mxu0 %v5317_v41  ;;  %v2836_v44 = vld [vmem:[%s5313_s13 + $0x28] sm:$0xff] }
 0x1c4   : > { %v5360_v36 = vand.u32 4294901760, %v2836_v44 }
 0x1c5   : > { %v2785_v21 = vsel %vm2784_vm2, %v1346_v32, %v2779_v28  ;;  %2941 = vmatpush.msra.mxu2 %v2894_v33 }
 0x1d2   : > { %v2235_v52 = vpop.f32.mrf.mxu1 }
 0x1da   : > { %v2289_v27 = vpop.f32.mrf.mxu2 }
 0x1dc   : > { %v2134_v59 = vpop.f32.mrf.mxu0 }
 0x1dd   : > { %v2236_v10 = vadd.f32 %v2235_v52, %v2134_v59  ;;  %v2328_v57 = vpop.f32.mrf.mxu3  ;;  %v2837_v59 = vld [vmem:[%s5313_s13 + $0x30] sm:$0xff]  ;;  %v2835_v52 = vld [vmem:[%s5313_s13 + $0x20] sm:$0xff] }
 0x1de   : > { %v5321_v13 = vand.u32 4294901760, %v2837_v59  ;;  %v5327_v19 = vand.u32 4294901760, %v2835_v52 }
 0x1df   : > { %v2290_v39 = vadd.f32 %v2289_v27, %v2236_v10  ;;  %v2895_v10 = vand.u32 4294901760, %v2894_v33  ;;  %v2833_v27 = vld [vmem:[%s5313_s13 + $0x10] sm:$0xff] }
 0x1e0   : > { %v2900_v12 = vsub.f32 %v2837_v59, %v5321_v13  ;;  %2974 = vmatpush.msra.mxu3 %v5321_v13  ;;  %2866 = vmatpush.msra.mxu0 %v5321_v13  ;;  %v2906_v37 = vsub.f32 %v2835_v52, %v5327_v19  ;;  %v5333_v34 = vand.u32 4294901760, %v2833_v27 }
 0x1e1   : > { %v2329_v60 = vadd.f32 %v2328_v57, %v2290_v39  ;;  %v2896_v39 = vsub.f32 %v2894_v33, %v2895_v10  ;;  %v2831_v57 = vld [vmem:[%s5313_s13] sm:$0xff] }
 0x1e2   : > { %v2901_v24 = vand.u32 4294901760, %v2900_v12  ;;  %2944 = vmatpush.msra.mxu2 %v2900_v12  ;;  %2976 = vmatpush.msra.mxu3 %v5327_v19  ;;  %v2912_v17 = vsub.f32 %v2833_v27, %v5333_v34  ;;  %v5340_v40 = vand.u32 4294901760, %v2831_v57  ;;  %v3407_v27 = vld [vmem:[%s5442_s6] ss:$0 sm:$0xff] }
 0x1e3   : > { %2868 = vmatpush.msra.mxu0 %v5327_v19 }
 0x1e4   : > { %2947 = vmatpush.msra.mxu2 %v2906_v37  ;;  %2978 = vmatpush.msra.mxu3 %v5333_v34 }
 0x1e5   : > { %2870 = vmatpush.msra.mxu0 %v5333_v34 }
 0x1e6   : > { %2950 = vmatpush.msra.mxu2 %v2912_v17  ;;  %2980 = vmatpush.msra.mxu3 %v5340_v40 }
 0x1e7   : > { %2872 = vmatpush.msra.mxu0 %v5340_v40 }
 0x1e9   : > { %3002 = vmatpush.msrb.mxu0 %v2895_v10 }
 0x1eb   : > { %3006 = vmatpush.msrb.mxu0 %v2901_v24 }
 0x1f4   : > { %v2434_v62 = vpop.f32.mrf.mxu1 }
 0x1fc   : > { %v2475_v20 = vpop.f32.mrf.mxu2 }
 0x1fe   : > { %v2397_v6 = vpop.f32.mrf.mxu0 }
 0x1ff   : > { %v2398_v58 = vadd.f32 %v2397_v6, %v2329_v60  ;;  %v2576_v45 = vpop.f32.mrf.mxu3  ;;  %v2897_v6 = vand.u32 4294901760, %v2896_v39  ;;  %v2902_v60 = vsub.f32 %v2900_v12, %v2901_v24  ;;  %v3406_v12 = vld [vmem:[%s5441_s5] ss:$0 sm:$0xff] }
 0x201   : > { %v2435_v61 = vadd.f32 %v2434_v62, %v2398_v58  ;;  %v2907_v58 = vand.u32 4294901760, %v2906_v37  ;;  %2898 = vmatpush.msra.mxu1 %v2897_v6  ;;  %v2903_v46 = vand.u32 4294901760, %v2902_v60  ;;  %v2913_v62 = vand.u32 4294901760, %v2912_v17 }
 0x203   : > { %v2476_v56 = vadd.f32 %v2475_v20, %v2435_v61  ;;  %v2908_v9 = vsub.f32 %v2906_v37, %v2907_v58  ;;  %v2918_v61 = vsub.f32 %v2831_v57, %v5340_v40  ;;  %2904 = vmatpush.msra.mxu1 %v2903_v46  ;;  %v2914_v20 = vsub.f32 %v2912_v17, %v2913_v62 }
 0x204   : > { %3010 = vmatpush.msrb.mxu0 %v2907_v58 }
 0x205   : > { %v2577_v7 = vadd.f32 %v2576_v45, %v2476_v56  ;;  %v2909_v38 = vand.u32 4294901760, %v2908_v9  ;;  %v2850_v56 = vsel %vm2845_vm6, %v2840_v54, 0  ;;  %v2919_v0 = vand.u32 4294901760, %v2918_v61  ;;  %2953 = vmatpush.msra.mxu2 %v2918_v61 }
 0x206   : > { %v5348_v22 = vand.u32 4294901760, %v2850_v56  ;;  %v2915_v45 = vand.u32 4294901760, %v2914_v20  ;;  %3014 = vmatpush.msrb.mxu0 %v2913_v62 }
 0x207   : > { %2910 = vmatpush.msra.mxu1 %v2909_v38  ;;  %v2920_v29 = vsub.f32 %v2918_v61, %v2919_v0 }
 0x208   : > { %3062 = vmatpush.msrb.mxu2 %v5348_v22  ;;  %3018 = vmatpush.msrb.mxu0 %v2919_v0 }
 0x209   : > { %2916 = vmatpush.msra.mxu1 %v2915_v45 }
 0x216   : > { %v2669_v55 = vpop.f32.mrf.mxu1 }
 0x21e   : > { %v2630_v25 = vpop.f32.mrf.mxu0  ;;  %v2738_v3 = vpop.f32.mrf.mxu2 }
 0x21f   : > { %v2631_v11 = vadd.f32 %v2630_v25, %v2577_v7  ;;  %v2838_v7 = vld [vmem:[%s5313_s13 + $0x38] sm:$0xff]  ;;  %v5353_v25 = vsub.f32 %v2850_v56, %v5348_v22 }
 0x220   : > { %v2775_v5 = vpop.f32.mrf.mxu3 }
 0x221   : > { %v2670_v2 = vadd.f32 %v2669_v55, %v2631_v11  ;;  %v5355_v11 = vand.u32 4294901760, %v2838_v7  ;;  %v2921_v55 = vand.u32 4294901760, %v2920_v29 }
 0x223   : > { %v2739_v18 = vadd.f32 %v2738_v3, %v2670_v2  ;;  %3064 = vmatpush.msrb.mxu2 %v5355_v11  ;;  %v3093_v2 = vand.u32 4294901760, %v5353_v25  ;;  %v5363_v3 = vsub.f32 %v2838_v7, %v5355_v11  ;;  %2922 = vmatpush.msra.mxu1 %v2921_v55 }
 0x225   : > { %v2776_v49 = vadd.f32 %v2775_v5, %v2739_v18  ;;  %v2834_v18 = vld [vmem:[%s5313_s13 + $0x18] sm:$0xff]  ;;  %v3094_v5 = vsub.f32 %v5353_v25, %v3093_v2  ;;  %3066 = vmatpush.msrb.mxu2 %v5360_v36  ;;  %3036 = vmatpush.msrb.mxu1 %v5317_v41 }
 0x226   : > { %v5371_v32 = vand.u32 4294901760, %v2834_v18 }
 0x227   : > { %v2782_v8 = vrot.slane %v2776_v49, 6  ;;  %v3099_v49 = vand.u32 4294901760, %v5363_v3  ;;  %3038 = vmatpush.msrb.mxu1 %v5321_v13 }
 0x228   : > { %3068 = vmatpush.msrb.mxu2 %v5371_v32  ;;  %v5388_v30 = vsub.f32 %v2834_v18, %v5371_v32 }
 0x229   : > { %v2787_v35 = vsel %vm2786_vm3, %v2785_v21, %v2782_v8  ;;  %v5374_v8 = vsub.f32 %v2836_v44, %v5360_v36  ;;  %v2832_v21 = vld [vmem:[%s5313_s13 + $0x8] sm:$0xff]  ;;  %3040 = vmatpush.msrb.mxu1 %v5327_v19 }
 0x22a   : > { %v2789_v63 = vadd.f32 %v2788_v16, %v2787_v35  ;;  %v3095_v35 = vand.u32 4294901760, %v3094_v5  ;;  %v5384_v26 = vand.u32 4294901760, %v2832_v21 }
 0x22b   : > { %3042 = vmatpush.msrb.mxu1 %v5333_v34 }
 0x22c   : > { %v2791_v14 = vsel %vm2790_vm4, %v2789_v63, 0.0  ;;  %3096 = vmatpush.msrb.mxu3 %v3095_v35  ;;  %3070 = vmatpush.msrb.mxu2 %v5384_v26  ;;  %v5393_v53 = vsub.f32 %v2832_v21, %v5384_v26 }
 0x22d   : > { %2792 = vadd.xlane.f32.xlu0 %v2791_v14  ;;  %v3105_v14 = vand.u32 4294901760, %v5374_v8  ;;  %3044 = vmatpush.msrb.mxu1 %v5340_v40 }
 0x22f   : > { %v3106_v15 = vsub.f32 %v5374_v8, %v3105_v14 }
 0x2a0   : > { %v2793_v43 = vpop.xlane.xlu0 %2792 }
 0x2a1   : > { %v2801_v4 = vmul.f32 %v5301_v1, %v2793_v43  ;;  %v3107_v43 = vand.u32 4294901760, %v3106_v15 }
 0x2a3   : > { %v5304_v50 = vsub.f32 %v2789_v63, %v2801_v4  ;;  %v3100_v63 = vsub.f32 %v5363_v3, %v3099_v49  ;;  %v3117_v4 = vand.u32 4294901760, %v5393_v53 }
 0x2a5   : > { %v2803_v31 = vmul.f32 %v5304_v50, %v5304_v50  ;;  %v3101_v23 = vand.u32 4294901760, %v3100_v63 }
 0x2a7   : > { %v2804_v47 = vsel %vm2790_vm4, %v2803_v31, 0.0  ;;  %3102 = vmatpush.msrb.mxu3 %v3101_v23 }
 0x2a8   : > { %2805 = vadd.xlane.f32.xlu0 %v2804_v47  ;;  %v3118_v47 = vsub.f32 %v5393_v53, %v3117_v4 }
 0x2a9   : > { %3108 = vmatpush.msrb.mxu3 %v3107_v43 }
 0x2aa   : > { %v3119_v48 = vand.u32 4294901760, %v3118_v47 }
 0x31b   : > { %v2806_v28 = vpop.xlane.xlu0 %2805 }
 0x31c   : > { %v2807_v16 = vmul.f32 %v2806_v28, %v5301_v1  ;;  %v3111_v1 = vand.u32 4294901760, %v5388_v30 }
 0x31e   : > { %v2808_v51 = vadd.f32 1e-05, %v2807_v16  ;;  %v3112_v31 = vsub.f32 %v5388_v30, %v3111_v1 }
 0x320   : > { %3410 = vrsqrt.f32 %v2808_v51  ;;  %v3113_v42 = vand.u32 4294901760, %v3112_v31  ;;  %vm2815_vm8 = vweird.f32 %v2808_v51 }
 0x322   : > { %3114 = vmatpush.msrb.mxu3 %v3113_v42 }
 0x324   : > { %3120 = vmatpush.msrb.mxu3 %v3119_v48 }
 0x326   : > { %v3411_v41 = vpop.eup %3410 }
 0x327   : > { %v2810_v59 = vmul.f32 %v3411_v41, %v2808_v51  ;;  %vm2816_vm7 = vweird.f32 %v3411_v41 }
 0x328   : > { %vm2817_vm9 = vmor %vm2815_vm8, %vm2816_vm7 }
 0x329   : > { %v2811_v33 = vmul.f32 %v3411_v41, %v2810_v59 }
 0x32b   : > { %v2812_v13 = vmul.f32 0.5, %v2811_v33 }
 0x32d   : > { %v2813_v52 = vsub.f32 1.5, %v2812_v13 }
 0x32f   : > { %v2814_v10 = vmul.f32 %v3411_v41, %v2813_v52 }
 0x331   : > { %v2818_v19 = vsel %vm2817_vm9, %v3411_v41, %v2814_v10 }
 0x332   : > { %v2819_v39 = vmul.f32 %v2818_v19, %v5304_v50 }
 0x334   : > { %v2824_v24 = vmul.f32 %v3406_v12, %v2819_v39 }
 0x336   : > { %v2829_v37 = vadd.f32 %v3407_v27, %v2824_v24 }
 0x338   : > { %v2830_v34 = vmul.f32 0.25, %v2829_v37 }
 0x33a   : > { %v2843_v57 = vsel %vm2841_vm10, %v2830_v34, 0 }
 0x33b   : > { %v2873_v6 = vand.u32 4294901760, %v2843_v57 }
 0x33d   : > { %2924 = vmatmul.f32.vlgmr.msra.gmra.mxu1 %v2873_v6  ;;  %v2874_v60 = vsub.f32 %v2843_v57, %v2873_v6 }
 0x33e   : > { %3170 = vmatpush.msra.mxu1 %v5348_v22 }
 0x33f   : > { %2956 = vmatmul.f32.vlgmr.msra.gmra.mxu2 %v2874_v60  ;;  %v2875_v58 = vand.u32 4294901760, %v2874_v60 }
 0x340   : > { %3172 = vmatpush.msra.mxu1 %v5355_v11  ;;  %3200 = vmatpush.msra.mxu2 %v3093_v2 }
 0x341   : > { %2984 = vmatmul.f32.vlgmr.msra.gmra.mxu3 %v2875_v58  ;;  %v2876_v17 = vsub.f32 %v2874_v60, %v2875_v58 }
 0x342   : > { %3174 = vmatpush.msra.mxu1 %v5360_v36  ;;  %3204 = vmatpush.msra.mxu2 %v3099_v49 }
 0x343   : > { %v2877_v50 = vand.u32 4294901760, %v2876_v17  ;;  %3234 = vmatpush.msra.mxu3 %v5348_v22 }
 0x344   : > { %3176 = vmatpush.msra.mxu1 %v5371_v32  ;;  %3208 = vmatpush.msra.mxu2 %v3105_v14 }
 0x345   : > { %2878 = vmatmul.f32.vlgmr.msra.gmra.mxu0 %v2877_v50  ;;  %3046 = vmatmul.f32.vlgmr.msrb.gmra.mxu1 %v2873_v6 }
 0x346   : > { %3236 = vmatpush.msra.mxu3 %v5355_v11  ;;  %3139 = vmatpush.msra.mxu0 %v5353_v25 }
 0x347   : > { %3076 = vmatmul.f32.vlgmr.msrb.gmra.mxu2 %v2877_v50  ;;  %3178 = vmatpush.msra.mxu1 %v5384_v26 }
 0x348   : > { %3212 = vmatpush.msra.mxu2 %v3111_v1  ;;  %3238 = vmatpush.msra.mxu3 %v5360_v36 }
 0x349   : > { %3122 = vmatmul.f32.vlgmr.msrb.gmra.mxu3 %v2873_v6  ;;  %3142 = vmatpush.msra.mxu0 %v5363_v3 }
 0x34a   : > { %3216 = vmatpush.msra.mxu2 %v3117_v4  ;;  %3240 = vmatpush.msra.mxu3 %v5371_v32 }
 0x34b   : > { %3145 = vmatpush.msra.mxu0 %v5374_v8 }
 0x34c   : > { %3242 = vmatpush.msra.mxu3 %v5384_v26 }
 0x34d   : > { %3020 = vmatmul.f32.vlgmr.msrb.gmra.mxu0 %v2873_v6  ;;  %3182 = vmatmul.f32.vlgmr.msra.gmra.mxu1 %v2875_v58 }
 0x34e   : > { %3148 = vmatpush.msra.mxu0 %v5388_v30 }
 0x34f   : > { %3218 = vmatmul.f32.vlgmr.msra.gmra.mxu2 %v2873_v6 }
 0x350   : > { %3151 = vmatpush.msra.mxu0 %v5393_v53 }
 0x351   : > { %3244 = vmatmul.f32.vlgmr.msra.gmra.mxu3 %v2873_v6 }
 0x355   : > { %3154 = vmatmul.f32.vlgmr.msra.gmra.mxu0 %v2874_v60 }
 0x3ba   : > { %v2925_v40 = vpop.f32.mrf.mxu1 }
 0x3c2   : > { %v2879_v46 = vpop.f32.mrf.mxu0  ;;  %v2957_v9 = vpop.f32.mrf.mxu2 }
 0x3c3   : > { %v3047_v61 = vpop.f32.mrf.mxu1  ;;  %v2926_v20 = vadd.f32 %v2925_v40, %v2879_v46 }
 0x3c4   : > { %v2985_v62 = vpop.f32.mrf.mxu3 }
 0x3c5   : > { %v2958_v0 = vadd.f32 %v2957_v9, %v2926_v20 }
 0x3c7   : > { %v2986_v25 = vadd.f32 %v2985_v62, %v2958_v0 }
 0x3ca   : > { %v3021_v54 = vpop.f32.mrf.mxu0  ;;  %v3077_v38 = vpop.f32.mrf.mxu2 }
 0x3cb   : > { %v3183_v29 = vpop.f32.mrf.mxu1  ;;  %v3022_v55 = vadd.f32 %v3021_v54, %v2986_v25 }
 0x3cc   : > { %v3123_v56 = vpop.f32.mrf.mxu3 }
 0x3cd   : > { %v3124_v22 = vadd.f32 %v3123_v56, %v3077_v38  ;;  %v3048_v18 = vadd.f32 %v3047_v61, %v3022_v55 }
 0x3d2   : > { %v3155_v45 = vpop.f32.mrf.mxu0  ;;  %v3219_v44 = vpop.f32.mrf.mxu2 }
 0x3d3   : > { %v3156_v7 = vadd.f32 %v3155_v45, %v3124_v22 }
 0x3d4   : > { %v3245_v36 = vpop.f32.mrf.mxu3 }
 0x3d5   : > { %v3184_v11 = vadd.f32 %v3183_v29, %v3156_v7 }
 0x3d7   : > { %v3220_v2 = vadd.f32 %v3219_v44, %v3184_v11 }
 0x3d9   : > { %v3246_v3 = vadd.f32 %v3245_v36, %v3220_v2 }
 0x3db   : > { %v3250_v28 = vrot.slane %v3246_v3, 4 }
 0x3dd   : > { %v3251_v5 = vsel %vm2845_vm6, %v3048_v18, %v3250_v28 }
 0x3de   : > { %3256 = vst.msk [vmem:[%s319_s21] sm:$0x77] %vm3255_vm13, %v3251_v5 }
 0x3df PF: > { %s18_s27 = sadd.s32 1, %s3418_s27  }
 0x3e0   : > { %p15_p4 = scmp.ge.s32.totalorder %s18_s27, 4  }
 0x3e2   :  { %17 = sbr.rel (!%p15_p4) target bundleno = 1 (0x1), region = 87 }

</bundles_post_ra>
